<compile_context>
chip_gen: v6e
topology: v6e:2x2x1
jax: 0.10.0
libtpu: 0.0.40
codegen_flags: <defaults>
</compile_context>

<pallas_src>
import functools

import jax
import jax.numpy as jnp
from jax.experimental import pallas as pl
from jax.experimental.pallas import tpu as pltpu


# ----------------------------- kernel helpers ------------------------------

def _layer_norm(x, gamma, beta, eps=1e-6):
    mu = jnp.mean(x, axis=-1, keepdims=True)
    var = jnp.mean(jnp.square(x - mu), axis=-1, keepdims=True)
    return (x - mu) * jax.lax.rsqrt(var + eps) * gamma + beta


def _gelu_exact(x):
    # Matches torch.nn.GELU() default (erf form).
    return 0.5 * x * (1.0 + jax.lax.erf(x * (2.0 ** -0.5)))


# --------------------------------- kernel ----------------------------------

def block_kernel(x_ref,
                 g1_ref, b1_ref,
                 wqkv_ref, bqkv_ref,
                 wproj_ref, bproj_ref,
                 g2_ref, b2_ref,
                 wfc1_ref, bfc1_ref,
                 wfc2_ref, bfc2_ref,
                 o_ref,
                 *, n_heads, head_dim, mm_dtype, approx_recip):
    N, D = x_ref.shape                       # one batch element: (tokens, dim)
    x = x_ref[...]                           # f32

    # ---------------- attention branch ----------------
    xn = _layer_norm(x, g1_ref[...], b1_ref[...])

    # Lane-dense fused QKV: one (N, D) x (D, 3D) MXU matmul, f32 accumulation.
    qkv = jnp.dot(xn.astype(mm_dtype), wqkv_ref[...],
                  preferred_element_type=jnp.float32) + bqkv_ref[...]   # (N, 3D)

    scale = head_dim ** (-0.5)
    acc = jnp.zeros((N, D), jnp.float32)
    for h in range(n_heads):                 # static loop; static 32-lane slices
        q = qkv[:, h * head_dim:(h + 1) * head_dim]                      # (N, hd)
        k = qkv[:, D + h * head_dim:D + (h + 1) * head_dim]              # (N, hd)
        v = qkv[:, 2 * D + h * head_dim:2 * D + (h + 1) * head_dim]      # (N, hd)

        # s = q @ k^T without an explicit transpose (contract last dims).
        s = jax.lax.dot_general(q.astype(mm_dtype), k.astype(mm_dtype),
                                (((1,), (1,)), ((), ())),
                                preferred_element_type=jnp.float32) * scale  # (N, N)
        m = jnp.max(s, axis=-1, keepdims=True)
        e = jnp.exp(s - m)
        denom = jnp.sum(e, axis=-1, keepdims=True)
        if approx_recip:
            p = e * pl.reciprocal(denom, approx=True)   # EUP slot (bf16 path)
        else:
            p = e / denom                               # exact (f32 verification path)

        o_h = jnp.dot(p.astype(mm_dtype), v.astype(mm_dtype),
                      preferred_element_type=jnp.float32)                # (N, hd)
        # Per-head output-projection accumulation (no concat over heads).
        acc = acc + jnp.dot(o_h.astype(mm_dtype), wproj_ref[h],
                            preferred_element_type=jnp.float32)          # (N, D)

    x1 = x + acc + bproj_ref[...]            # residual 1 (proj bias added once)

    # ------------------- MLP branch --------------------
    xn2 = _layer_norm(x1, g2_ref[...], b2_ref[...])
    h1 = jnp.dot(xn2.astype(mm_dtype), wfc1_ref[...],
                 preferred_element_type=jnp.float32) + bfc1_ref[...]
    h1 = _gelu_exact(h1)
    h2 = jnp.dot(h1.astype(mm_dtype), wfc2_ref[...],
                 preferred_element_type=jnp.float32) + bfc2_ref[...]

    o_ref[...] = (x1 + h2).astype(o_ref.dtype)   # lane-dense (N, D) store


# ------------------- one-time parameter preprocessing ------------------------

def preprocess_params(params, n_heads, mm_dtype=jnp.bfloat16):
    """Weight re-layout / casts done ONCE, outside the per-call path."""
    D = params["wproj"].shape[0]
    hd = D // n_heads
    return {
        "g1": params["g1"].astype(jnp.float32),
        "b1": params["b1"].astype(jnp.float32),
        # (D, 3D); columns ordered [q | k | v], each head-contiguous (matches the
        # PyTorch reshape(n, t, 3, n_heads, head_dim) layout).
        "wqkv": params["wqkv"].astype(mm_dtype),
        "bqkv": params["bqkv"].astype(jnp.float32),          # (1, 3D)
        "wproj_h": params["wproj"].reshape(n_heads, hd, D).astype(mm_dtype),
        "bproj": params["bproj"].astype(jnp.float32),
        "g2": params["g2"].astype(jnp.float32),
        "b2": params["b2"].astype(jnp.float32),
        "wfc1": params["wfc1"].astype(mm_dtype),
        "bfc1": params["bfc1"].astype(jnp.float32),
        "wfc2": params["wfc2"].astype(mm_dtype),
        "bfc2": params["bfc2"].astype(jnp.float32),
    }


# -------------------------------- wrapper -----------------------------------

def transformer_block(x, pp, n_heads, mm_dtype=jnp.bfloat16):
    B, N, D = x.shape
    hd = D // n_heads
    x = x.astype(jnp.float32)

    weight_args = (pp["g1"], pp["b1"],
                   pp["wqkv"], pp["bqkv"],
                   pp["wproj_h"], pp["bproj"],
                   pp["g2"], pp["b2"],
                   pp["wfc1"], pp["bfc1"],
                   pp["wfc2"], pp["bfc2"])

    # Weights: constant index_map along the batch-grid axis -> stay VMEM-resident.
    def const_spec(arr):
        nd = arr.ndim
        return pl.BlockSpec(arr.shape, lambda b, _nd=nd: (0,) * _nd)

    approx_recip = jnp.dtype(mm_dtype) != jnp.dtype(jnp.float32)
    kernel = functools.partial(block_kernel, n_heads=n_heads, head_dim=hd,
                               mm_dtype=mm_dtype, approx_recip=approx_recip)

    out = pl.pallas_call(
        kernel,
        out_shape=jax.ShapeDtypeStruct((B, N, D), jnp.float32),
        grid=(B,),                                            # parallel over batch
        in_specs=[pl.BlockSpec((None, N, D), lambda b: (b, 0, 0))]   # x: one batch elem
                 + [const_spec(a) for a in weight_args],
        out_specs=pl.BlockSpec((None, N, D), lambda b: (b, 0, 0)),
        compiler_params=pltpu.CompilerParams(
            dimension_semantics=("parallel",),                # v7x: shard over 2 TCs
            vmem_limit_bytes=32 * 1024 * 1024),
    )(x, *weight_args)

    return out


# ------------------------- pure-JAX reference --------------------------------

def reference_block(x, p, n_heads):
    def ln(v, g, b):
        mu = v.mean(-1, keepdims=True)
        var = ((v - mu) ** 2).mean(-1, keepdims=True)
        return (v - mu) / jnp.sqrt(var + 1e-6) * g + b

    B, N, D = x.shape
    hd = D // n_heads

    xn = ln(x, p["g1"], p["b1"])
    qkv = xn @ p["wqkv"] + p["bqkv"]
    qkv = qkv.reshape(B, N, 3, n_heads, hd).transpose(2, 0, 3, 1, 4)
    q, k, v = qkv[0], qkv[1], qkv[2]
    s = jnp.einsum("bhqd,bhkd->bhqk", q, k) * (hd ** -0.5)
    a = jax.nn.softmax(s, axis=-1)
    o = jnp.einsum("bhqk,bhkd->bhqd", a, v).transpose(0, 2, 1, 3).reshape(B, N, D)
    x1 = x + o @ p["wproj"] + p["bproj"]

    xn2 = ln(x1, p["g2"], p["b2"])
    h = jax.nn.gelu(xn2 @ p["wfc1"] + p["bfc1"], approximate=False)
    return x1 + h @ p["wfc2"] + p["bfc2"]


# --------------------------------- main --------------------------------------

if __name__ == "__main__":
    B, N, D = 2, 8, 128          # batch, tokens, embed dim (D multiple of 128)
    n_heads = 4                  # head_dim = 32
    mlp_ratio = 4.0
    H = int(D * mlp_ratio)       # 512

    key = jax.random.PRNGKey(0)
    ks = jax.random.split(key, 10)

    def rnd(k, shape, scale=0.02):
        return (scale * jax.random.normal(k, shape)).astype(jnp.float32)

    params = {
        "g1":    jnp.ones((1, D), jnp.float32),
        "b1":    jnp.zeros((1, D), jnp.float32),
        "wqkv":  rnd(ks[0], (D, 3 * D)),
        "bqkv":  rnd(ks[1], (1, 3 * D)),
        "wproj": rnd(ks[2], (D, D)),
        "bproj": rnd(ks[3], (1, D)),
        "g2":    jnp.ones((1, D), jnp.float32),
        "b2":    jnp.zeros((1, D), jnp.float32),
        "wfc1":  rnd(ks[4], (D, H)),
        "bfc1":  rnd(ks[5], (1, H)),
        "wfc2":  rnd(ks[6], (H, D)),
        "bfc2":  rnd(ks[7], (1, D)),
    }

    x = jax.random.normal(ks[8], (B, N, D), dtype=jnp.float32)
    ref = jax.block_until_ready(reference_block(x, params, n_heads))

    # f32 matmul path (exact softmax divide): tight check vs the PyTorch-equivalent ref.
    pp_f32 = jax.tree_util.tree_map(jax.block_until_ready,
                                    preprocess_params(params, n_heads, jnp.float32))
    out_f32 = jax.block_until_ready(
        transformer_block(x, pp_f32, n_heads, mm_dtype=jnp.float32))
    assert out_f32.shape == (B, N, D)
    assert jnp.allclose(out_f32, ref, atol=1e-3, rtol=1e-3), (
        f"f32 max abs err {jnp.max(jnp.abs(out_f32 - ref))}")

    # bf16 matmul path (v6e/v7x performance config): looser tolerance.
    pp_bf16 = jax.tree_util.tree_map(jax.block_until_ready,
                                     preprocess_params(params, n_heads, jnp.bfloat16))
    out_bf16 = jax.block_until_ready(
        transformer_block(x, pp_bf16, n_heads, mm_dtype=jnp.bfloat16))
    assert out_bf16.shape == (B, N, D)
    assert jnp.allclose(out_bf16, ref, atol=1e-2, rtol=1e-2), (
        f"bf16 max abs err {jnp.max(jnp.abs(out_bf16 - ref))}")

    print("KERNEL_OK")
</pallas_src>

<mosaic_0001>
module attributes {stable_mosaic.version = 11 : i64} {
  func.func @block_kernel(%arg0: i32, %arg1: memref<1x8x128xf32, #tpu.memory_space<vmem>>, %arg2: memref<1x128xf32, #tpu.memory_space<vmem>>, %arg3: memref<1x128xf32, #tpu.memory_space<vmem>>, %arg4: memref<128x384xf32, #tpu.memory_space<vmem>>, %arg5: memref<1x384xf32, #tpu.memory_space<vmem>>, %arg6: memref<4x32x128xf32, #tpu.memory_space<vmem>>, %arg7: memref<1x128xf32, #tpu.memory_space<vmem>>, %arg8: memref<1x128xf32, #tpu.memory_space<vmem>>, %arg9: memref<1x128xf32, #tpu.memory_space<vmem>>, %arg10: memref<128x512xf32, #tpu.memory_space<vmem>>, %arg11: memref<1x512xf32, #tpu.memory_space<vmem>>, %arg12: memref<512x128xf32, #tpu.memory_space<vmem>>, %arg13: memref<1x128xf32, #tpu.memory_space<vmem>>, %arg14: memref<1x8x128xf32, #tpu.memory_space<vmem>>) attributes {dimension_semantics = [#tpu.dimension_semantics<parallel>], iteration_bounds = array<i64: 2>, scalar_prefetch = 0 : i64, scratch_operands = 0 : i64, tpu.core_type = #tpu.core_type<tc>, window_params = [{transform_indices = @transform_0, window_bounds = array<i64: 1, 8, 128>}, {pipeline_mode = #tpu.pipeline_mode<synchronous>, transform_indices = @transform_1, window_bounds = array<i64: 1, 128>}, {pipeline_mode = #tpu.pipeline_mode<synchronous>, transform_indices = @transform_2, window_bounds = array<i64: 1, 128>}, {pipeline_mode = #tpu.pipeline_mode<synchronous>, transform_indices = @transform_3, window_bounds = array<i64: 128, 384>}, {pipeline_mode = #tpu.pipeline_mode<synchronous>, transform_indices = @transform_4, window_bounds = array<i64: 1, 384>}, {pipeline_mode = #tpu.pipeline_mode<synchronous>, transform_indices = @transform_5, window_bounds = array<i64: 4, 32, 128>}, {pipeline_mode = #tpu.pipeline_mode<synchronous>, transform_indices = @transform_6, window_bounds = array<i64: 1, 128>}, {pipeline_mode = #tpu.pipeline_mode<synchronous>, transform_indices = @transform_7, window_bounds = array<i64: 1, 128>}, {pipeline_mode = #tpu.pipeline_mode<synchronous>, transform_indices = @transform_8, window_bounds = array<i64: 1, 128>}, {pipeline_mode = #tpu.pipeline_mode<synchronous>, transform_indices = @transform_9, window_bounds = array<i64: 128, 512>}, {pipeline_mode = #tpu.pipeline_mode<synchronous>, transform_indices = @transform_10, window_bounds = array<i64: 1, 512>}, {pipeline_mode = #tpu.pipeline_mode<synchronous>, transform_indices = @transform_11, window_bounds = array<i64: 512, 128>}, {pipeline_mode = #tpu.pipeline_mode<synchronous>, transform_indices = @transform_12, window_bounds = array<i64: 1, 128>}, {transform_indices = @transform_13, window_bounds = array<i64: 1, 8, 128>}]} {
    %c0 = arith.constant 0 : index
    %c0_0 = arith.constant 0 : index
    %c0_1 = arith.constant 0 : index
    %0 = vector.load %arg1[%c0, %c0_0, %c0_1] : memref<1x8x128xf32, #tpu.memory_space<vmem>>, vector<1x8x128xf32>
    %1 = vector.shape_cast %0 : vector<1x8x128xf32> to vector<8x128xf32>
    %c0_2 = arith.constant 0 : index
    %c0_3 = arith.constant 0 : index
    %2 = vector.load %arg2[%c0_2, %c0_3] : memref<1x128xf32, #tpu.memory_space<vmem>>, vector<1x128xf32>
    %c0_4 = arith.constant 0 : index
    %c0_5 = arith.constant 0 : index
    %3 = vector.load %arg3[%c0_4, %c0_5] : memref<1x128xf32, #tpu.memory_space<vmem>>, vector<1x128xf32>
    %cst = arith.constant dense<0.000000e+00> : vector<8xf32>
    %4 = vector.multi_reduction <add>, %1, %cst [1] : vector<8x128xf32> to vector<8xf32>
    %5 = vector.shape_cast %4 : vector<8xf32> to vector<8x1xf32>
    %cst_6 = arith.constant 1.280000e+02 : f32
    %6 = vector.broadcast %cst_6 : f32 to vector<8x1xf32>
    %7 = arith.divf %5, %6 : vector<8x1xf32>
    %8 = vector.broadcast %7 : vector<8x1xf32> to vector<8x128xf32>
    %9 = arith.subf %1, %8 : vector<8x128xf32>
    %10 = arith.mulf %9, %9 : vector<8x128xf32>
    %cst_7 = arith.constant dense<0.000000e+00> : vector<8xf32>
    %11 = vector.multi_reduction <add>, %10, %cst_7 [1] : vector<8x128xf32> to vector<8xf32>
    %12 = vector.shape_cast %11 : vector<8xf32> to vector<8x1xf32>
    %cst_8 = arith.constant 1.280000e+02 : f32
    %13 = vector.broadcast %cst_8 : f32 to vector<8x1xf32>
    %14 = arith.divf %12, %13 : vector<8x1xf32>
    %15 = vector.broadcast %7 : vector<8x1xf32> to vector<8x128xf32>
    %16 = arith.subf %1, %15 : vector<8x128xf32>
    %cst_9 = arith.constant 9.99999997E-7 : f32
    %17 = vector.broadcast %cst_9 : f32 to vector<8x1xf32>
    %18 = arith.addf %14, %17 : vector<8x1xf32>
    %19 = math.rsqrt %18 : vector<8x1xf32>
    %20 = vector.broadcast %19 : vector<8x1xf32> to vector<8x128xf32>
    %21 = arith.mulf %16, %20 : vector<8x128xf32>
    %22 = vector.broadcast %2 : vector<1x128xf32> to vector<8x128xf32>
    %23 = arith.mulf %21, %22 : vector<8x128xf32>
    %24 = vector.broadcast %3 : vector<1x128xf32> to vector<8x128xf32>
    %25 = arith.addf %23, %24 : vector<8x128xf32>
    %c0_10 = arith.constant 0 : index
    %c0_11 = arith.constant 0 : index
    %26 = vector.load %arg4[%c0_10, %c0_11] : memref<128x384xf32, #tpu.memory_space<vmem>>, vector<128x384xf32>
    %cst_12 = arith.constant dense<0.000000e+00> : vector<8x384xf32>
    %27 = tpu.matmul %25, %26, %cst_12 {dimension_numbers = #tpu.dot_dimension_numbers<[1], [0], [0], [1], [0, 0, 1, 1], [], []>} : vector<8x128xf32>, vector<128x384xf32>, vector<8x384xf32> -> vector<8x384xf32>
    %c0_13 = arith.constant 0 : index
    %c0_14 = arith.constant 0 : index
    %28 = vector.load %arg5[%c0_13, %c0_14] : memref<1x384xf32, #tpu.memory_space<vmem>>, vector<1x384xf32>
    %29 = vector.broadcast %28 : vector<1x384xf32> to vector<8x384xf32>
    %30 = arith.addf %27, %29 : vector<8x384xf32>
    %cst_15 = arith.constant 0.000000e+00 : f32
    %31 = vector.broadcast %cst_15 : f32 to vector<8x128xf32>
    %32 = vector.extract_strided_slice %30 {offsets = [0, 0], sizes = [8, 32], strides = [1, 1]} : vector<8x384xf32> to vector<8x32xf32>
    %33 = vector.extract_strided_slice %30 {offsets = [0, 128], sizes = [8, 32], strides = [1, 1]} : vector<8x384xf32> to vector<8x32xf32>
    %34 = vector.extract_strided_slice %30 {offsets = [0, 256], sizes = [8, 32], strides = [1, 1]} : vector<8x384xf32> to vector<8x32xf32>
    %cst_16 = arith.constant dense<0.000000e+00> : vector<8x8xf32>
    %35 = tpu.matmul %32, %33, %cst_16 {dimension_numbers = #tpu.dot_dimension_numbers<[1], [1], [0], [0], [0, 0, 1, 0], [], []>} : vector<8x32xf32>, vector<8x32xf32>, vector<8x8xf32> -> vector<8x8xf32>
    %cst_17 = arith.constant 0.176776692 : f32
    %36 = vector.broadcast %cst_17 : f32 to vector<8x8xf32>
    %37 = arith.mulf %35, %36 : vector<8x8xf32>
    %cst_18 = arith.constant dense<0xFF800000> : vector<8xf32>
    %38 = vector.multi_reduction <maximumf>, %37, %cst_18 [1] : vector<8x8xf32> to vector<8xf32>
    %39 = vector.shape_cast %38 : vector<8xf32> to vector<8x1xf32>
    %40 = vector.broadcast %39 : vector<8x1xf32> to vector<8x8xf32>
    %41 = arith.subf %37, %40 : vector<8x8xf32>
    %42 = math.exp %41 : vector<8x8xf32>
    %cst_19 = arith.constant dense<0.000000e+00> : vector<8xf32>
    %43 = vector.multi_reduction <add>, %42, %cst_19 [1] : vector<8x8xf32> to vector<8xf32>
    %44 = vector.shape_cast %43 : vector<8xf32> to vector<8x1xf32>
    %45 = vector.broadcast %44 : vector<8x1xf32> to vector<8x8xf32>
    %46 = arith.divf %42, %45 : vector<8x8xf32>
    %cst_20 = arith.constant dense<0.000000e+00> : vector<8x32xf32>
    %47 = tpu.matmul %46, %34, %cst_20 {dimension_numbers = #tpu.dot_dimension_numbers<[1], [0], [0], [1], [0, 0, 1, 1], [], []>} : vector<8x8xf32>, vector<8x32xf32>, vector<8x32xf32> -> vector<8x32xf32>
    %c0_21 = arith.constant 0 : index
    %c0_22 = arith.constant 0 : index
    %c0_23 = arith.constant 0 : index
    %48 = vector.load %arg6[%c0_21, %c0_22, %c0_23] : memref<4x32x128xf32, #tpu.memory_space<vmem>>, vector<1x32x128xf32>
    %49 = vector.shape_cast %48 : vector<1x32x128xf32> to vector<32x128xf32>
    %cst_24 = arith.constant dense<0.000000e+00> : vector<8x128xf32>
    %50 = tpu.matmul %47, %49, %cst_24 {dimension_numbers = #tpu.dot_dimension_numbers<[1], [0], [0], [1], [0, 0, 1, 1], [], []>} : vector<8x32xf32>, vector<32x128xf32>, vector<8x128xf32> -> vector<8x128xf32>
    %51 = arith.addf %31, %50 : vector<8x128xf32>
    %52 = vector.extract_strided_slice %30 {offsets = [0, 32], sizes = [8, 32], strides = [1, 1]} : vector<8x384xf32> to vector<8x32xf32>
    %53 = vector.extract_strided_slice %30 {offsets = [0, 160], sizes = [8, 32], strides = [1, 1]} : vector<8x384xf32> to vector<8x32xf32>
    %54 = vector.extract_strided_slice %30 {offsets = [0, 288], sizes = [8, 32], strides = [1, 1]} : vector<8x384xf32> to vector<8x32xf32>
    %cst_25 = arith.constant dense<0.000000e+00> : vector<8x8xf32>
    %55 = tpu.matmul %52, %53, %cst_25 {dimension_numbers = #tpu.dot_dimension_numbers<[1], [1], [0], [0], [0, 0, 1, 0], [], []>} : vector<8x32xf32>, vector<8x32xf32>, vector<8x8xf32> -> vector<8x8xf32>
    %cst_26 = arith.constant 0.176776692 : f32
    %56 = vector.broadcast %cst_26 : f32 to vector<8x8xf32>
    %57 = arith.mulf %55, %56 : vector<8x8xf32>
    %cst_27 = arith.constant dense<0xFF800000> : vector<8xf32>
    %58 = vector.multi_reduction <maximumf>, %57, %cst_27 [1] : vector<8x8xf32> to vector<8xf32>
    %59 = vector.shape_cast %58 : vector<8xf32> to vector<8x1xf32>
    %60 = vector.broadcast %59 : vector<8x1xf32> to vector<8x8xf32>
    %61 = arith.subf %57, %60 : vector<8x8xf32>
    %62 = math.exp %61 : vector<8x8xf32>
    %cst_28 = arith.constant dense<0.000000e+00> : vector<8xf32>
    %63 = vector.multi_reduction <add>, %62, %cst_28 [1] : vector<8x8xf32> to vector<8xf32>
    %64 = vector.shape_cast %63 : vector<8xf32> to vector<8x1xf32>
    %65 = vector.broadcast %64 : vector<8x1xf32> to vector<8x8xf32>
    %66 = arith.divf %62, %65 : vector<8x8xf32>
    %cst_29 = arith.constant dense<0.000000e+00> : vector<8x32xf32>
    %67 = tpu.matmul %66, %54, %cst_29 {dimension_numbers = #tpu.dot_dimension_numbers<[1], [0], [0], [1], [0, 0, 1, 1], [], []>} : vector<8x8xf32>, vector<8x32xf32>, vector<8x32xf32> -> vector<8x32xf32>
    %c1 = arith.constant 1 : index
    %c0_30 = arith.constant 0 : index
    %c0_31 = arith.constant 0 : index
    %68 = vector.load %arg6[%c1, %c0_30, %c0_31] : memref<4x32x128xf32, #tpu.memory_space<vmem>>, vector<1x32x128xf32>
    %69 = vector.shape_cast %68 : vector<1x32x128xf32> to vector<32x128xf32>
    %cst_32 = arith.constant dense<0.000000e+00> : vector<8x128xf32>
    %70 = tpu.matmul %67, %69, %cst_32 {dimension_numbers = #tpu.dot_dimension_numbers<[1], [0], [0], [1], [0, 0, 1, 1], [], []>} : vector<8x32xf32>, vector<32x128xf32>, vector<8x128xf32> -> vector<8x128xf32>
    %71 = arith.addf %51, %70 : vector<8x128xf32>
    %72 = vector.extract_strided_slice %30 {offsets = [0, 64], sizes = [8, 32], strides = [1, 1]} : vector<8x384xf32> to vector<8x32xf32>
    %73 = vector.extract_strided_slice %30 {offsets = [0, 192], sizes = [8, 32], strides = [1, 1]} : vector<8x384xf32> to vector<8x32xf32>
    %74 = vector.extract_strided_slice %30 {offsets = [0, 320], sizes = [8, 32], strides = [1, 1]} : vector<8x384xf32> to vector<8x32xf32>
    %cst_33 = arith.constant dense<0.000000e+00> : vector<8x8xf32>
    %75 = tpu.matmul %72, %73, %cst_33 {dimension_numbers = #tpu.dot_dimension_numbers<[1], [1], [0], [0], [0, 0, 1, 0], [], []>} : vector<8x32xf32>, vector<8x32xf32>, vector<8x8xf32> -> vector<8x8xf32>
    %cst_34 = arith.constant 0.176776692 : f32
    %76 = vector.broadcast %cst_34 : f32 to vector<8x8xf32>
    %77 = arith.mulf %75, %76 : vector<8x8xf32>
    %cst_35 = arith.constant dense<0xFF800000> : vector<8xf32>
    %78 = vector.multi_reduction <maximumf>, %77, %cst_35 [1] : vector<8x8xf32> to vector<8xf32>
    %79 = vector.shape_cast %78 : vector<8xf32> to vector<8x1xf32>
    %80 = vector.broadcast %79 : vector<8x1xf32> to vector<8x8xf32>
    %81 = arith.subf %77, %80 : vector<8x8xf32>
    %82 = math.exp %81 : vector<8x8xf32>
    %cst_36 = arith.constant dense<0.000000e+00> : vector<8xf32>
    %83 = vector.multi_reduction <add>, %82, %cst_36 [1] : vector<8x8xf32> to vector<8xf32>
    %84 = vector.shape_cast %83 : vector<8xf32> to vector<8x1xf32>
    %85 = vector.broadcast %84 : vector<8x1xf32> to vector<8x8xf32>
    %86 = arith.divf %82, %85 : vector<8x8xf32>
    %cst_37 = arith.constant dense<0.000000e+00> : vector<8x32xf32>
    %87 = tpu.matmul %86, %74, %cst_37 {dimension_numbers = #tpu.dot_dimension_numbers<[1], [0], [0], [1], [0, 0, 1, 1], [], []>} : vector<8x8xf32>, vector<8x32xf32>, vector<8x32xf32> -> vector<8x32xf32>
    %c2 = arith.constant 2 : index
    %c0_38 = arith.constant 0 : index
    %c0_39 = arith.constant 0 : index
    %88 = vector.load %arg6[%c2, %c0_38, %c0_39] : memref<4x32x128xf32, #tpu.memory_space<vmem>>, vector<1x32x128xf32>
    %89 = vector.shape_cast %88 : vector<1x32x128xf32> to vector<32x128xf32>
    %cst_40 = arith.constant dense<0.000000e+00> : vector<8x128xf32>
    %90 = tpu.matmul %87, %89, %cst_40 {dimension_numbers = #tpu.dot_dimension_numbers<[1], [0], [0], [1], [0, 0, 1, 1], [], []>} : vector<8x32xf32>, vector<32x128xf32>, vector<8x128xf32> -> vector<8x128xf32>
    %91 = arith.addf %71, %90 : vector<8x128xf32>
    %92 = vector.extract_strided_slice %30 {offsets = [0, 96], sizes = [8, 32], strides = [1, 1]} : vector<8x384xf32> to vector<8x32xf32>
    %93 = vector.extract_strided_slice %30 {offsets = [0, 224], sizes = [8, 32], strides = [1, 1]} : vector<8x384xf32> to vector<8x32xf32>
    %94 = vector.extract_strided_slice %30 {offsets = [0, 352], sizes = [8, 32], strides = [1, 1]} : vector<8x384xf32> to vector<8x32xf32>
    %cst_41 = arith.constant dense<0.000000e+00> : vector<8x8xf32>
    %95 = tpu.matmul %92, %93, %cst_41 {dimension_numbers = #tpu.dot_dimension_numbers<[1], [1], [0], [0], [0, 0, 1, 0], [], []>} : vector<8x32xf32>, vector<8x32xf32>, vector<8x8xf32> -> vector<8x8xf32>
    %cst_42 = arith.constant 0.176776692 : f32
    %96 = vector.broadcast %cst_42 : f32 to vector<8x8xf32>
    %97 = arith.mulf %95, %96 : vector<8x8xf32>
    %cst_43 = arith.constant dense<0xFF800000> : vector<8xf32>
    %98 = vector.multi_reduction <maximumf>, %97, %cst_43 [1] : vector<8x8xf32> to vector<8xf32>
    %99 = vector.shape_cast %98 : vector<8xf32> to vector<8x1xf32>
    %100 = vector.broadcast %99 : vector<8x1xf32> to vector<8x8xf32>
    %101 = arith.subf %97, %100 : vector<8x8xf32>
    %102 = math.exp %101 : vector<8x8xf32>
    %cst_44 = arith.constant dense<0.000000e+00> : vector<8xf32>
    %103 = vector.multi_reduction <add>, %102, %cst_44 [1] : vector<8x8xf32> to vector<8xf32>
    %104 = vector.shape_cast %103 : vector<8xf32> to vector<8x1xf32>
    %105 = vector.broadcast %104 : vector<8x1xf32> to vector<8x8xf32>
    %106 = arith.divf %102, %105 : vector<8x8xf32>
    %cst_45 = arith.constant dense<0.000000e+00> : vector<8x32xf32>
    %107 = tpu.matmul %106, %94, %cst_45 {dimension_numbers = #tpu.dot_dimension_numbers<[1], [0], [0], [1], [0, 0, 1, 1], [], []>} : vector<8x8xf32>, vector<8x32xf32>, vector<8x32xf32> -> vector<8x32xf32>
    %c3 = arith.constant 3 : index
    %c0_46 = arith.constant 0 : index
    %c0_47 = arith.constant 0 : index
    %108 = vector.load %arg6[%c3, %c0_46, %c0_47] : memref<4x32x128xf32, #tpu.memory_space<vmem>>, vector<1x32x128xf32>
    %109 = vector.shape_cast %108 : vector<1x32x128xf32> to vector<32x128xf32>
    %cst_48 = arith.constant dense<0.000000e+00> : vector<8x128xf32>
    %110 = tpu.matmul %107, %109, %cst_48 {dimension_numbers = #tpu.dot_dimension_numbers<[1], [0], [0], [1], [0, 0, 1, 1], [], []>} : vector<8x32xf32>, vector<32x128xf32>, vector<8x128xf32> -> vector<8x128xf32>
    %111 = arith.addf %91, %110 : vector<8x128xf32>
    %112 = arith.addf %1, %111 : vector<8x128xf32>
    %c0_49 = arith.constant 0 : index
    %c0_50 = arith.constant 0 : index
    %113 = vector.load %arg7[%c0_49, %c0_50] : memref<1x128xf32, #tpu.memory_space<vmem>>, vector<1x128xf32>
    %114 = vector.broadcast %113 : vector<1x128xf32> to vector<8x128xf32>
    %115 = arith.addf %112, %114 : vector<8x128xf32>
    %c0_51 = arith.constant 0 : index
    %c0_52 = arith.constant 0 : index
    %116 = vector.load %arg8[%c0_51, %c0_52] : memref<1x128xf32, #tpu.memory_space<vmem>>, vector<1x128xf32>
    %c0_53 = arith.constant 0 : index
    %c0_54 = arith.constant 0 : index
    %117 = vector.load %arg9[%c0_53, %c0_54] : memref<1x128xf32, #tpu.memory_space<vmem>>, vector<1x128xf32>
    %cst_55 = arith.constant dense<0.000000e+00> : vector<8xf32>
    %118 = vector.multi_reduction <add>, %115, %cst_55 [1] : vector<8x128xf32> to vector<8xf32>
    %119 = vector.shape_cast %118 : vector<8xf32> to vector<8x1xf32>
    %cst_56 = arith.constant 1.280000e+02 : f32
    %120 = vector.broadcast %cst_56 : f32 to vector<8x1xf32>
    %121 = arith.divf %119, %120 : vector<8x1xf32>
    %122 = vector.broadcast %121 : vector<8x1xf32> to vector<8x128xf32>
    %123 = arith.subf %115, %122 : vector<8x128xf32>
    %124 = arith.mulf %123, %123 : vector<8x128xf32>
    %cst_57 = arith.constant dense<0.000000e+00> : vector<8xf32>
    %125 = vector.multi_reduction <add>, %124, %cst_57 [1] : vector<8x128xf32> to vector<8xf32>
    %126 = vector.shape_cast %125 : vector<8xf32> to vector<8x1xf32>
    %cst_58 = arith.constant 1.280000e+02 : f32
    %127 = vector.broadcast %cst_58 : f32 to vector<8x1xf32>
    %128 = arith.divf %126, %127 : vector<8x1xf32>
    %129 = vector.broadcast %121 : vector<8x1xf32> to vector<8x128xf32>
    %130 = arith.subf %115, %129 : vector<8x128xf32>
    %cst_59 = arith.constant 9.99999997E-7 : f32
    %131 = vector.broadcast %cst_59 : f32 to vector<8x1xf32>
    %132 = arith.addf %128, %131 : vector<8x1xf32>
    %133 = math.rsqrt %132 : vector<8x1xf32>
    %134 = vector.broadcast %133 : vector<8x1xf32> to vector<8x128xf32>
    %135 = arith.mulf %130, %134 : vector<8x128xf32>
    %136 = vector.broadcast %116 : vector<1x128xf32> to vector<8x128xf32>
    %137 = arith.mulf %135, %136 : vector<8x128xf32>
    %138 = vector.broadcast %117 : vector<1x128xf32> to vector<8x128xf32>
    %139 = arith.addf %137, %138 : vector<8x128xf32>
    %c0_60 = arith.constant 0 : index
    %c0_61 = arith.constant 0 : index
    %140 = vector.load %arg10[%c0_60, %c0_61] : memref<128x512xf32, #tpu.memory_space<vmem>>, vector<128x512xf32>
    %cst_62 = arith.constant dense<0.000000e+00> : vector<8x512xf32>
    %141 = tpu.matmul %139, %140, %cst_62 {dimension_numbers = #tpu.dot_dimension_numbers<[1], [0], [0], [1], [0, 0, 1, 1], [], []>} : vector<8x128xf32>, vector<128x512xf32>, vector<8x512xf32> -> vector<8x512xf32>
    %c0_63 = arith.constant 0 : index
    %c0_64 = arith.constant 0 : index
    %142 = vector.load %arg11[%c0_63, %c0_64] : memref<1x512xf32, #tpu.memory_space<vmem>>, vector<1x512xf32>
    %143 = vector.broadcast %142 : vector<1x512xf32> to vector<8x512xf32>
    %144 = arith.addf %141, %143 : vector<8x512xf32>
    %cst_65 = arith.constant 5.000000e-01 : f32
    %145 = vector.broadcast %cst_65 : f32 to vector<8x512xf32>
    %146 = arith.mulf %145, %144 : vector<8x512xf32>
    %cst_66 = arith.constant 0.707106769 : f32
    %147 = vector.broadcast %cst_66 : f32 to vector<8x512xf32>
    %148 = arith.mulf %144, %147 : vector<8x512xf32>
    %149 = math.erf %148 : vector<8x512xf32>
    %cst_67 = arith.constant 1.000000e+00 : f32
    %150 = vector.broadcast %cst_67 : f32 to vector<8x512xf32>
    %151 = arith.addf %150, %149 : vector<8x512xf32>
    %152 = arith.mulf %146, %151 : vector<8x512xf32>
    %c0_68 = arith.constant 0 : index
    %c0_69 = arith.constant 0 : index
    %153 = vector.load %arg12[%c0_68, %c0_69] : memref<512x128xf32, #tpu.memory_space<vmem>>, vector<512x128xf32>
    %cst_70 = arith.constant dense<0.000000e+00> : vector<8x128xf32>
    %154 = tpu.matmul %152, %153, %cst_70 {dimension_numbers = #tpu.dot_dimension_numbers<[1], [0], [0], [1], [0, 0, 1, 1], [], []>} : vector<8x512xf32>, vector<512x128xf32>, vector<8x128xf32> -> vector<8x128xf32>
    %c0_71 = arith.constant 0 : index
    %c0_72 = arith.constant 0 : index
    %155 = vector.load %arg13[%c0_71, %c0_72] : memref<1x128xf32, #tpu.memory_space<vmem>>, vector<1x128xf32>
    %156 = vector.broadcast %155 : vector<1x128xf32> to vector<8x128xf32>
    %157 = arith.addf %154, %156 : vector<8x128xf32>
    %158 = arith.addf %115, %157 : vector<8x128xf32>
    %c0_73 = arith.constant 0 : index
    %c0_74 = arith.constant 0 : index
    %c0_75 = arith.constant 0 : index
    %159 = vector.load %arg14[%c0_73, %c0_74, %c0_75] : memref<1x8x128xf32, #tpu.memory_space<vmem>>, vector<1x8x128xf32>
    %160 = vector.shape_cast %159 : vector<1x8x128xf32> to vector<8x128xf32>
    %161 = vector.shape_cast %158 : vector<8x128xf32> to vector<1x8x128xf32>
    tpu.vector_store %arg14[%c0_73, %c0_74, %c0_75], %161 {strides = array<i32>} : memref<1x8x128xf32, #tpu.memory_space<vmem>>, vector<1x8x128xf32>,
    return
  }
  func.func @transform_0(%arg0: i32) -> (i32, i32, i32) {
    %c0_i32 = arith.constant 0 : i32
    %c0_i32_0 = arith.constant 0 : i32
    %c0_i32_1 = arith.constant 0 : i32
    return %arg0, %c0_i32, %c0_i32_0 : i32, i32, i32
  }
  func.func @transform_1(%arg0: i32) -> (i32, i32) {
    %c0_i32 = arith.constant 0 : i32
    %c0_i32_0 = arith.constant 0 : i32
    %c0_i32_1 = arith.constant 0 : i32
    return %c0_i32, %c0_i32_0 : i32, i32
  }
  func.func @transform_2(%arg0: i32) -> (i32, i32) {
    %c0_i32 = arith.constant 0 : i32
    %c0_i32_0 = arith.constant 0 : i32
    %c0_i32_1 = arith.constant 0 : i32
    return %c0_i32, %c0_i32_0 : i32, i32
  }
  func.func @transform_3(%arg0: i32) -> (i32, i32) {
    %c0_i32 = arith.constant 0 : i32
    %c0_i32_0 = arith.constant 0 : i32
    %c0_i32_1 = arith.constant 0 : i32
    return %c0_i32, %c0_i32_0 : i32, i32
  }
  func.func @transform_4(%arg0: i32) -> (i32, i32) {
    %c0_i32 = arith.constant 0 : i32
    %c0_i32_0 = arith.constant 0 : i32
    %c0_i32_1 = arith.constant 0 : i32
    return %c0_i32, %c0_i32_0 : i32, i32
  }
  func.func @transform_5(%arg0: i32) -> (i32, i32, i32) {
    %c0_i32 = arith.constant 0 : i32
    %c0_i32_0 = arith.constant 0 : i32
    %c0_i32_1 = arith.constant 0 : i32
    %c0_i32_2 = arith.constant 0 : i32
    return %c0_i32, %c0_i32_0, %c0_i32_1 : i32, i32, i32
  }
  func.func @transform_6(%arg0: i32) -> (i32, i32) {
    %c0_i32 = arith.constant 0 : i32
    %c0_i32_0 = arith.constant 0 : i32
    %c0_i32_1 = arith.constant 0 : i32
    return %c0_i32, %c0_i32_0 : i32, i32
  }
  func.func @transform_7(%arg0: i32) -> (i32, i32) {
    %c0_i32 = arith.constant 0 : i32
    %c0_i32_0 = arith.constant 0 : i32
    %c0_i32_1 = arith.constant 0 : i32
    return %c0_i32, %c0_i32_0 : i32, i32
  }
  func.func @transform_8(%arg0: i32) -> (i32, i32) {
    %c0_i32 = arith.constant 0 : i32
    %c0_i32_0 = arith.constant 0 : i32
    %c0_i32_1 = arith.constant 0 : i32
    return %c0_i32, %c0_i32_0 : i32, i32
  }
  func.func @transform_9(%arg0: i32) -> (i32, i32) {
    %c0_i32 = arith.constant 0 : i32
    %c0_i32_0 = arith.constant 0 : i32
    %c0_i32_1 = arith.constant 0 : i32
    return %c0_i32, %c0_i32_0 : i32, i32
  }
  func.func @transform_10(%arg0: i32) -> (i32, i32) {
    %c0_i32 = arith.constant 0 : i32
    %c0_i32_0 = arith.constant 0 : i32
    %c0_i32_1 = arith.constant 0 : i32
    return %c0_i32, %c0_i32_0 : i32, i32
  }
  func.func @transform_11(%arg0: i32) -> (i32, i32) {
    %c0_i32 = arith.constant 0 : i32
    %c0_i32_0 = arith.constant 0 : i32
    %c0_i32_1 = arith.constant 0 : i32
    return %c0_i32, %c0_i32_0 : i32, i32
  }
  func.func @transform_12(%arg0: i32) -> (i32, i32) {
    %c0_i32 = arith.constant 0 : i32
    %c0_i32_0 = arith.constant 0 : i32
    %c0_i32_1 = arith.constant 0 : i32
    return %c0_i32, %c0_i32_0 : i32, i32
  }
  func.func @transform_13(%arg0: i32) -> (i32, i32, i32) {
    %c0_i32 = arith.constant 0 : i32
    %c0_i32_0 = arith.constant 0 : i32
    %c0_i32_1 = arith.constant 0 : i32
    return %arg0, %c0_i32, %c0_i32_0 : i32, i32, i32
  }
}

</mosaic_0001>

<bundles_post_ra>
// kernel: tpu_custom_call.1
= control target key start
LH: loop header
LB: loop body
LE: loop exit
PB: predicated region body
PF: predicated region fallthrough
CT: control target
= control target key end

     0   :  { %s3579_s0 = inlined_call_operand.hbm [shape: f32[2,8,128], index: 0, kind: input, shape index: {}]   ;;  %s3580_s1 = inlined_call_operand.hbm [shape: f32[1,128], index: 1, kind: input, shape index: {}]   ;;  %s3581_s2 = inlined_call_operand.hbm [shape: f32[1,128], index: 2, kind: input, shape index: {}]   ;;  %s3582_s3 = inlined_call_operand.hbm [shape: f32[128,384], index: 3, kind: input, shape index: {}]   ;;  %s3583_s4 = inlined_call_operand.vmem [shape: f32[1,384], index: 4, kind: input, shape index: {}]   ;;  %s3584_s5 = inlined_call_operand.hbm [shape: f32[4,32,128], index: 5, kind: input, shape index: {}]   ;;  %s3585_s6 = inlined_call_operand.vmem [shape: f32[1,128], index: 6, kind: input, shape index: {}]   ;;  %s3586_s7 = inlined_call_operand.vmem [shape: f32[1,128], index: 7, kind: input, shape index: {}]   ;;  %s3587_s8 = inlined_call_operand.vmem [shape: f32[1,128], index: 8, kind: input, shape index: {}]   ;;  %s3588_s9 = inlined_call_operand.hbm [shape: f32[128,512], index: 9, kind: input, shape index: {}]   ;;  %s3589_s10 = inlined_call_operand.vmem [shape: f32[1,512], index: 10, kind: input, shape index: {}]   ;;  %s3590_s11 = inlined_call_operand.hbm [shape: f32[512,128], index: 11, kind: input, shape index: {}]   ;;  %s3591_s12 = inlined_call_operand.vmem [shape: f32[1,128], index: 12, kind: input, shape index: {}]   ;;  %s3592_s13 = inlined_call_operand.hbm [shape: f32[2,8,128], index: 13, kind: output, shape index: {}]  }
   0x1   :  { %3598 = sst [smem:[#allocation22_spill]] %s3580_s1 }
   0x2   :  { %3599 = sst [smem:[#allocation23_spill]] %s3581_s2 }
   0x3   :  { %3600 = sst [smem:[#allocation24_spill]] %s3582_s3 }
   0x4   :  { %3601 = sst [smem:[#allocation25_spill]] %s3584_s5 }
   0x5   :  { %3602 = sst [smem:[#allocation26_spill]] %s3588_s9 }
   0x6   :  { %3603 = sst [smem:[#allocation27_spill]] %s3590_s11 }
   0x7   :  { %18 = vsyncpa [#allocation3], 0 }
   0x8   :  { %20 = vsyncpa [#allocation3 + $0x1], 0 }
   0x9   :  { %21 = vsyncpa [#allocation6], 0 }
   0xa   :  { %22 = vsyncpa [#allocation9], 0 }
   0xb   :  { %23 = vsyncpa [#allocation12], 0 }
   0xc   :  { %24 = vsyncpa [#allocation4], 0 }
   0xd   :  { %26 = vsyncpa [#allocation4 + $0x1], 0  ;;  %s3172_s25 = smov 0   ;;  %s3174_s26 = smov 0  }
   0xe   :  { %s3176_s27 = smov 0   ;;  %s3178_s28 = smov 0  }
   0xf LB: > { %3604 = sst [smem:[#allocation20_spill]] %s3077_s27  ;;  %s3083_s29 = smov [#allocation5]   ;;  %s3081_s28 = sphi %s3178_s28, %s3636_s28   ;;  %s3077_s27 = sphi %s3176_s27, %s3633_s27   ;;  %s3073_s26 = sphi %s3174_s26, %s3635_s26   ;;  %s3069_s25 = sphi %s3172_s25, %s3634_s25  }
  0x10   : > { %s354_s30 = sshll.u32 %s3083_s29, 4  ;;  %s3193_s14 = sadd.s32 4294967295, %s3081_s28   ;;  %s355_s30 = int_to_ptr.vmem [resolvable:$true] %s354_s30 }
  0x11   : > { %p2388_p0 = scmp.ge.s32.totalorder %s3081_s28, 1  ;;  %p3593_p1 = scmp.eq.s32.totalorder %s3193_s14, 0 }
  0x12   : > { %p341_p2 = scmp.lt.s32.totalorder %s3081_s28, 3  ;;  %s3084_s16 = smov [#allocation8]  }
  0x13   : > { %s375_s17 = sshll.u32 %s3084_s16, 4  ;;  %s3085_s19 = smov [#allocation11]   ;;  %s3205_s17 = int_to_ptr.vmem [resolvable:$true] %s375_s17 }
  0x14   : > { %p3198_p3 = pnand %p2388_p0, %p341_p2  ;;  %s413_s20 = sshll.u32 %s3085_s19, 4  ;;  %s3213_s20 = int_to_ptr.vmem [resolvable:$true] %s413_s20 }
  0x15   : > { %s2832_s22 = scalar_lea.vmem %s355_s30, 16  ;;  %s2839_s23 = scalar_lea.vmem %s355_s30, 32 }
  0x16   : > { %s3605_s15 = scalar_select %p3198_p3, 1, 0 }
  0x17   : > { %p2703_p5 = pneg %p3198_p3  ;;  %p2833_p8 = scmp.ne.s32.totalorder %s355_s30, %s2832_s22 }
  0x18   : > { %p2840_p11 = scmp.lt.s32.totalorder %s355_s30, %s355_s30  ;;  %p2841_p12 = scmp.lt.s32.totalorder %s2839_s23, %s2832_s22 }
  0x19   : > { %p3209_p6 = pnand %p2703_p5, %p3593_p1 }
  0x1a   : > { %p2842_p13 = por %p2841_p12, %p2840_p11 }
  0x1b   : > { %p3217_p7 = pneg %p3209_p6 }
  0x1d   : > { %p2835_p9 = pnand %p2833_p8, %p3217_p7 }
  0x1f   : > { %p2836_p10 = pneg %p2835_p9 }
  0x21   : > { %p2843_p0 = pnand %p2842_p13, %p2836_p10 }
  0x23   : > { %2846 = shalt.err (!%p2843_p0)
}
  0x24   : > { %s3608_s1 = sld [smem:[#allocation22_spill]]  ;;  %s2858_s16 = scalar_lea.vmem %s3205_s17, 6144 }
  0x25   : > { %p2859_p2 = scmp.ne.s32.totalorder %s3205_s17, %s2858_s16  ;;  %p2866_p9 = scmp.lt.s32.totalorder %s3205_s17, %s3205_s17 }
  0x26   : > { %p2867_p11 = scmp.lt.s32.totalorder %s2858_s16, %s2858_s16 }
  0x27   : > { %p2861_p5 = pnand %p2859_p2, %p3217_p7 }
  0x28   : > { %p2868_p10 = por %p2867_p11, %p2866_p9 }
  0x29   : > { %p2862_p8 = pneg %p2861_p5 }
  0x2a   : > { %2706 = dma.hbm_to_vmem [thread:$0]  (!%p3209_p6), %s3608_s1, 16, %s355_s30, [#allocation6]  }
  0x2b   : > { %p2869_p12 = pnand %p2868_p10, %p2862_p8 }
  0x2d   : > { %2872 = shalt.err (!%p2869_p12)
}
  0x2e   : > { %s3086_s19 = smov 384   ;;  %s3087_s22 = smov 24  }
  0x2f   : > { %s3609_s3 = sld [smem:[#allocation24_spill]]  ;;  %s2884_s24 = scalar_lea.vmem %s3213_s20, 8192 }
  0x30   : > { %p2885_p13 = scmp.ne.s32.totalorder %s3213_s20, %s2884_s24  ;;  %p2892_p5 = scmp.lt.s32.totalorder %s3213_s20, %s3213_s20 }
  0x31   : > { %p2893_p8 = scmp.lt.s32.totalorder %s2884_s24, %s2884_s24 }
  0x32   : > { %p2887_p0 = pnand %p2885_p13, %p3217_p7 }
  0x33   : > { %p2894_p9 = por %p2893_p8, %p2892_p5 }
  0x34   : > { %p2888_p2 = pneg %p2887_p0 }
  0x35   : > { %2712 = dma.hbm_to_vmem [thread:$0]  (!%p3209_p6), %s3609_s3, 6144, %s3205_s17, [#allocation9], %s3086_s19, %s3086_s19, %s3087_s22  }
  0x36   : > { %p2895_p11 = pnand %p2894_p9, %p2888_p2 }
  0x38   : > { %2898 = shalt.err (!%p2895_p11)
}
  0x39   : > { %s3088_s29 = smov 512   ;;  %s3089_s16 = smov 32  }
  0x3a   : > { %s3610_s9 = sld [smem:[#allocation26_spill]]  ;;  %s3090_s17 = smov [#allocation7]  }
  0x3b   : > { %s365_s19 = sshll.u32 %s3090_s17, 4  ;;  %s3091_s22 = smov [#allocation10]   ;;  %s366_s19 = int_to_ptr.vmem [resolvable:$true] %s365_s19 }
  0x3c   : > { %s391_s23 = sshll.u32 %s3091_s22, 4  ;;  %s2910_s3 = scalar_lea.vmem %s366_s19, 16  ;;  %s392_s23 = int_to_ptr.vmem [resolvable:$true] %s391_s23 }
  0x3d   : > { %p2911_p10 = scmp.ne.s32.totalorder %s366_s19, %s2910_s3  ;;  %s2917_s24 = scalar_lea.vmem %s366_s19, 32 }
  0x3e   : > { %p2918_p0 = scmp.lt.s32.totalorder %s366_s19, %s366_s19  ;;  %p2919_p2 = scmp.lt.s32.totalorder %s2917_s24, %s2910_s3 }
  0x3f   : > { %p2913_p12 = pnand %p2911_p10, %p3217_p7 }
  0x40   : > { %2718 = dma.hbm_to_vmem [thread:$0]  (!%p3209_p6), %s3610_s9, 8192, %s3213_s20, [#allocation12], %s3088_s29, %s3088_s29, %s3089_s16  }
  0x41   : > { %p2914_p13 = pneg %p2913_p12  ;;  %p2920_p5 = por %p2919_p2, %p2918_p0 }
  0x43   : > { %p2921_p8 = pnand %p2920_p5, %p2914_p13 }
  0x45   : > { %2924 = shalt.err (!%p2921_p8)
}
  0x46   : > { %s3611_s2 = sld [smem:[#allocation23_spill]]  ;;  %s2936_s29 = scalar_lea.vmem %s392_s23, 2048 }
  0x47   : > { %p2937_p9 = scmp.ne.s32.totalorder %s392_s23, %s2936_s29  ;;  %p2944_p12 = scmp.lt.s32.totalorder %s392_s23, %s392_s23 }
  0x48   : > { %p2945_p4 = scmp.lt.s32.totalorder %s2936_s29, %s2936_s29 }
  0x49   : > { %p2939_p11 = pnand %p2937_p9, %p3217_p7 }
  0x4a   : > { %p2946_p1 = por %p2945_p4, %p2944_p12 }
  0x4b   : > { %p2940_p10 = pneg %p2939_p11 }
  0x4c   : > { %2709 = dma.hbm_to_vmem [thread:$0]  (!%p3209_p6), %s3611_s2, 16, %s366_s19, [#allocation6]  }
  0x4d   : > { %p2947_p3 = pnand %p2946_p1, %p2940_p10 }
  0x4f   : > { %2950 = shalt.err (!%p2947_p3)
}
  0x50   : > { %s3092_s3 = smov 128   ;;  %s3093_s16 = smov 8  }
  0x51   : > { %s3612_s5 = sld [smem:[#allocation25_spill]]  ;;  %s3094_s19 = smov [#allocation13]  }
  0x52   : > { %s429_s22 = sshll.u32 %s3094_s19, 4  ;;  %s430_s22 = int_to_ptr.vmem [resolvable:$true] %s429_s22 }
  0x53   : > { %s2962_s24 = scalar_lea.vmem %s430_s22, 8192  ;;  %p2970_p4 = scmp.lt.s32.totalorder %s430_s22, %s430_s22 }
  0x54   : > { %p2963_p13 = scmp.ne.s32.totalorder %s430_s22, %s2962_s24  ;;  %p2971_p1 = scmp.lt.s32.totalorder %s2962_s24, %s2962_s24 }
  0x56   : > { %p2965_p0 = pnand %p2963_p13, %p3217_p7  ;;  %p2972_p3 = por %p2971_p1, %p2970_p4 }
  0x57   : > { %2715 = dma.hbm_to_vmem [thread:$0]  (!%p3209_p6), %s3612_s5, 2048, %s392_s23, [#allocation9], %s3092_s3, %s3092_s3, %s3093_s16  }
  0x58   : > { %p2966_p2 = pneg %p2965_p0 }
  0x5a   : > { %p2973_p5 = pnand %p2972_p3, %p2966_p2 }
  0x5c   : > { %2976 = shalt.err (!%p2973_p5)
}
  0x5d   : > { %s3613_s11 = sld [smem:[#allocation27_spill]]  ;;  %s2387_s21 = sadd.s32 4294967294, %s3081_s28  }
  0x5e   : > { %s3275_s18 = sadd.s32 1, %s3081_s28   ;;  %s39_s29 = sadd.s32 1, %s3077_s27 }
  0x5f   : > { %s36_s23 = ssub.s32 %s3081_s28, %s3275_s18  ;;  %p46_p8 = scmp.ne.s32.totalorder %s3077_s27, %s3073_s26 }
  0x60   : > { %p37_p7 = scmp.eq.s32.totalorder %s36_s23, 0  ;;  %p47_p9 = scmp.eq.s32.totalorder %s3081_s28, 0 }
  0x61   : > { %p52_p11 = scmp.ne.s32.totalorder %s3073_s26, %s3069_s25  ;;  %p3616_p12 = scmp.eq.s32.totalorder %s3193_s14, 0 }
  0x62   : > { %s3286_s30 = scalar_select %p37_p7, %s3077_s27, %s39_s29  }
  0x63   : > { %2721 = dma.hbm_to_vmem [thread:$0]  (!%p3209_p6), %s3613_s11, 8192, %s430_s22, [#allocation12], %s3092_s3, %s3092_s3, %s3093_s16  }
  0x64   : > { %3614 = sst [smem:[#allocation21_spill]] %s3286_s30  ;;  %p3288_p10 = por %p47_p9, %p46_p8 }
  0x65   : > { %p3294_p6 = por %p3616_p12, %p52_p11  ;;  %p328_p13 = scmp.eq.s32.totalorder %s3193_s14, 1 }
  0x66   : > { %p334_p0 = scmp.eq.s32.totalorder %s2387_s21, 1  ;;  %p2736_p2 = scmp.lt.s32.totalorder %s3081_s28, 2 }
  0x67   : > { %s3617_s3 = scalar_select %p3294_p6, 1, 0 }
  0x68   : > { %s446_s16 = sand.u32 1, %s3077_s27   ;;  %p3301_p4 = por %p328_p13, %p46_p8 }
  0x69   : > { %p3305_p1 = por %p334_p0, %p52_p11  ;;  %s2396_s24 = sshll.u32 %s446_s16, 3 }
  0x6a   : > { %s3618_s19 = scalar_select %p3301_p4, 1, 0 }
  0x6b   : > { %s3619_s22 = scalar_select %p3305_p1, 1, 0 }
  0x6c   : > { %s2397_s1 = sshll.u32 %s3081_s28, 7  ;;  %s450_s21 = scalar_lea.vmem [#allocation2], %s2396_s24 }
  0x6d   : > { %s3313_s29 = scalar_lea.hbm %s3579_s0, %s2397_s1  ;;  %s457_s2 = sshll.u32 %s450_s21, 4  ;;  %s458_s2 = int_to_ptr.vmem [resolvable:$true] %s457_s2 }
  0x6e   : > { %p3317_p3 = pnand %p2736_p2, %p3288_p10  ;;  %s447_s9 = scalar_lea.sflag [#allocation3], %s446_s16 }
  0x6f   : > { %s2977_s11 = scalar_lea.hbm %s3313_s29, 128  ;;  %s2982_s23 = scalar_lea.hbm %s3579_s0, 256 }
  0x70   : > { %p2978_p5 = scmp.ne.s32.totalorder %s3313_s29, %s2977_s11  ;;  %p2979_p7 = pneg %p3317_p3 }
  0x71   : > { %p2983_p11 = scmp.lt.s32.totalorder %s3313_s29, %s3579_s0  ;;  %p2984_p10 = scmp.lt.s32.totalorder %s2982_s23, %s2977_s11 }
  0x72   : > { %p2980_p8 = pnand %p2979_p7, %p2978_p5 }
  0x73   : > { %p2985_p12 = por %p2984_p10, %p2983_p11 }
  0x74   : > { %p2981_p9 = pneg %p2980_p8 }
  0x76   : > { %p2986_p13 = pnand %p2985_p12, %p2981_p9 }
  0x78   : > { %2989 = shalt.err (!%p2986_p13)
}
  0x79   : > { %s2990_s17 = scalar_lea.vmem %s458_s2, 128  ;;  %s3095_s16 = smov [#allocation2]  }
  0x7a   : > { %p2991_p0 = scmp.ne.s32.totalorder %s458_s2, %s2990_s17  ;;  %s2995_s30 = sshll.u32 %s3095_s16, 4  ;;  %s2996_s30 = int_to_ptr.vmem [resolvable:$false] %s2995_s30 }
  0x7b   : > { %s2997_s27 = scalar_lea.vmem %s2996_s30, 256  ;;  %p2998_p5 = scmp.lt.s32.totalorder %s458_s2, %s2996_s30 }
  0x7c   : > { %p2993_p2 = pnand %p2991_p0, %p2979_p7  ;;  %p2999_p8 = scmp.lt.s32.totalorder %s2997_s27, %s2990_s17 }
  0x7e   : > { %p2994_p1 = pneg %p2993_p2  ;;  %p3000_p4 = por %p2999_p8, %p2998_p5 }
  0x80   : > { %p3001_p6 = pnand %p3000_p4, %p2994_p1 }
  0x82   : > { %3004 = shalt.err (!%p3001_p6)
}
  0x83   : > { %2725 = dma.hbm_to_vmem [thread:$0]  (!%p3317_p3), %s3313_s29, 128, %s458_s2, %s447_s9  }
  0x84   : > { %p3621_p9 = scmp.ne.s32.totalorder %s3605_s15, 0 }
  0x85   : > { %s3338_s11 = sand.u32 (!%p3621_p9), 1, %s3073_s26   ;;  %p3622_p4 = scmp.ne.s32.totalorder (!%p3621_p9), %s3617_s3, 0 }
  0x86   : > { %466 = sbr.rel (%p3621_p9) target bundleno = 3627 (0xe2b), region = 72  ;;  %s2399_s1 = sshll.u32 (!%p3621_p9), %s3338_s11, 3 }
  0x87   : > { %s469_s30 = scalar_lea.sflag (!%p3621_p9), [#allocation3], %s3338_s11  ;;  %s472_s27 = scalar_lea.vmem (!%p3621_p9), [#allocation2], %s2399_s1 }
  0x8b   : > { %3048 = dma.done.wait (%p3622_p4), %s469_s30, 128  }
  0x8c   : > { %3050 = vsyncadd (%p3622_p4), %s469_s30, 4294967168  ;;  %p3623_p6 = scmp.eq.s32.totalorder %s3193_s14, 0 }
  0x8e   : > { %3052 = dma.done.wait (%p3623_p6), [#allocation6], 32   ;;  %p3624_p1 = pmov %p3623_p6 }
  0x90   : > { %3054 = vsyncadd (%p3624_p1), [#allocation6], 4294967264  ;;  %p3625_p3 = pmov %p3624_p1 }
  0x91   : > { %p3626_p7 = pmov %p3624_p1 }
  0x92   : > { %3056 = dma.done.wait (%p3625_p3), [#allocation9], 8192  }
  0x93   : > { %3058 = vsyncadd (%p3626_p7), [#allocation9], 4294959104  ;;  %p3627_p11 = pmov %p3624_p1 }
  0x94   : > { %p3628_p10 = pmov %p3624_p1 }
  0x95   : > { %3060 = dma.done.wait (%p3627_p11), [#allocation12], 16384  }
  0x96   : > { %3062 = vsyncadd (%p3628_p10), [#allocation12], 4294950912  ;;  %v3360_v0 = vld [vmem:[%s472_s27] sm:$0xff]  ;;  %v3096_v4 = vmov 0.0   ;;  %v612_v7 = vld [vmem:[#allocation8 + $0x160] sm:$0xff]  ;;  %vm3097_vm0 = vmmov 0   ;;  %v618_v63 = vlaneseq }
  0x97   : > { %542 = vadd.xlane.f32.xlu0 %v3360_v0  ;;  %v614_v1 = vld [vmem:[#allocation8 + $0x170] sm:$0xff]  ;;  %v613_v2 = vld [vmem:[#allocation8 + $0x168] sm:$0xff]  ;;  %v615_v3 = vld [vmem:[#allocation8 + $0x178] sm:$0xff]  ;;  %2556 = vmatprep.subr.mxu1 %v3096_v4  ;;  %vm774_vm1 = vcmask 261120   ;;  %s3098_s9 = smov 96   ;;  %vm852_vm2 = vcmask 64512  }
  0x98   : > { %633 = vmatprep.subr.mxu0 %v614_v1  ;;  %v611_v5 = vld [vmem:[#allocation8 + $0x158] sm:$0xff]  ;;  %v610_v6 = vld [vmem:[#allocation8 + $0x150] sm:$0xff]  ;;  %2557 = vmatpush3.msra.mxu1 %v615_v3  ;;  %v608_v8 = vld [vmem:[#allocation8 + $0x140] sm:$0xff]  ;;  %v3394_v1 = vshrl.u32 %v618_v63, 7  ;;  %s3099_s15 = smov 64   ;;  %s3100_s3 = smov 32  }
  0x99   : > { %634 = vmatpush1.msra.mxu0 %v613_v2  ;;  %2558 = vmatprep.subr.mxu1 %v3096_v4  ;;  %v607_v9 = vld [vmem:[#allocation8 + $0x138] sm:$0xff]  ;;  %v609_v10 = vld [vmem:[#allocation8 + $0x148] sm:$0xff]  ;;  %v604_v12 = vld [vmem:[#allocation8 + $0x120] sm:$0xff]  ;;  %s2430_s5 = sshll.u32 %s3193_s14, 7  ;;  %s2247_s23 = scalar_lea.sflag [#allocation4], %s3338_s11 }
  0x9a   : > { %635 = vmatprep.subr.mxu0 %v611_v5  ;;  %2559 = vmatpush3.msra.mxu1 %v612_v7  ;;  %v605_v11 = vld [vmem:[#allocation8 + $0x128] sm:$0xff]  ;;  %v606_v13 = vld [vmem:[#allocation8 + $0x130] sm:$0xff]  ;;  %v603_v20 = vld [vmem:[#allocation8 + $0x118] sm:$0xff]  ;;  %v624_v2 = vsub.s32 1, %v3394_v1  ;;  %v620_v5 = vsub.s32 0, %v3394_v1  ;;  %s2258_s20 = scalar_lea.hbm %s3592_s13, %s2430_s5  ;;  %p3629_p13 = scmp.ne.s32.totalorder %s3618_s19, 0 }
  0x9b   : > { %636 = vmatpush1.msra.mxu0 %v610_v6  ;;  %2560 = vmatprep.subr.mxu1 %v3096_v4  ;;  %v602_v18 = vld [vmem:[#allocation8 + $0x110] sm:$0xff]  ;;  %v601_v19 = vld [vmem:[#allocation8 + $0x108] sm:$0xff]  ;;  %v599_v21 = vld [vmem:[#allocation8 + $0xf8] sm:$0xff]  ;;  %v628_v6 = vsub.s32 2, %v3394_v1  ;;  %s3101_s21 = smov [#allocation14]  }
  0x9c   : > { %637 = vmatprep.subr.mxu0 %v608_v8  ;;  %2561 = vmatpush3.msra.mxu1 %v609_v10  ;;  %v598_v22 = vld [vmem:[#allocation8 + $0xf0] sm:$0xff]  ;;  %v600_v23 = vld [vmem:[#allocation8 + $0x100] sm:$0xff]  ;;  %v595_v25 = vld [vmem:[#allocation8 + $0xd8] sm:$0xff]  ;;  %s3009_s14 = sshll.u32 %s3101_s21, 4  ;;  %s3010_s14 = int_to_ptr.vmem [resolvable:$false] %s3009_s14 }
  0x9d   : > { %638 = vmatpush1.msra.mxu0 %v607_v9  ;;  %2562 = vmatprep.subr.mxu1 %v3096_v4  ;;  %v596_v24 = vld [vmem:[#allocation8 + $0xe0] sm:$0xff]  ;;  %v597_v26 = vld [vmem:[#allocation8 + $0xe8] sm:$0xff]  ;;  %v594_v29 = vld [vmem:[#allocation8 + $0xd0] sm:$0xff] }
  0x9e   : > { %639 = vmatprep.subr.mxu0 %v605_v11  ;;  %2563 = vmatpush3.msra.mxu1 %v606_v13  ;;  %v593_v27 = vld [vmem:[#allocation8 + $0xc8] sm:$0xff]  ;;  %v592_v28 = vld [vmem:[#allocation8 + $0xc0] sm:$0xff]  ;;  %v590_v30 = vld [vmem:[#allocation8 + $0xb0] sm:$0xff] }
  0x9f   : > { %640 = vmatpush1.msra.mxu0 %v604_v12  ;;  %2564 = vmatprep.subr.mxu1 %v3096_v4  ;;  %v589_v31 = vld [vmem:[#allocation8 + $0xa8] sm:$0xff]  ;;  %v591_v32 = vld [vmem:[#allocation8 + $0xb8] sm:$0xff]  ;;  %v586_v34 = vld [vmem:[#allocation8 + $0x90] sm:$0xff] }
  0xa0   : > { %697 = vmatprep.mubr.f32.mxu0 %v3096_v4  ;;  %641 = vmatprep.subr.mxu0 %v602_v18  ;;  %v587_v33 = vld [vmem:[#allocation8 + $0x98] sm:$0xff]  ;;  %v588_v35 = vld [vmem:[#allocation8 + $0xa0] sm:$0xff]  ;;  %v585_v38 = vld [vmem:[#allocation8 + $0x88] sm:$0xff] }
  0xa1   : > { %642 = vmatpush1.msra.mxu0 %v601_v19  ;;  %2565 = vmatpush3.msra.mxu1 %v603_v20  ;;  %v584_v36 = vld [vmem:[#allocation8 + $0x80] sm:$0xff]  ;;  %v583_v37 = vld [vmem:[#allocation8 + $0x78] sm:$0xff]  ;;  %v581_v39 = vld [vmem:[#allocation8 + $0x68] sm:$0xff] }
  0xa2   : > { %643 = vmatprep.subr.mxu0 %v599_v21  ;;  %2566 = vmatprep.subr.mxu1 %v3096_v4  ;;  %v580_v40 = vld [vmem:[#allocation8 + $0x60] sm:$0xff]  ;;  %v582_v41 = vld [vmem:[#allocation8 + $0x70] sm:$0xff]  ;;  %v577_v43 = vld [vmem:[#allocation8 + $0x48] sm:$0xff] }
  0xa3   : > { %644 = vmatpush1.msra.mxu0 %v598_v22  ;;  %2567 = vmatpush3.msra.mxu1 %v600_v23  ;;  %v578_v42 = vld [vmem:[#allocation8 + $0x50] sm:$0xff]  ;;  %v579_v44 = vld [vmem:[#allocation8 + $0x58] sm:$0xff]  ;;  %v576_v47 = vld [vmem:[#allocation8 + $0x40] sm:$0xff] }
  0xa4   : > { %645 = vmatprep.subr.mxu0 %v596_v24  ;;  %2568 = vmatprep.subr.mxu1 %v3096_v4  ;;  %v575_v45 = vld [vmem:[#allocation8 + $0x38] sm:$0xff]  ;;  %v574_v46 = vld [vmem:[#allocation8 + $0x30] sm:$0xff]  ;;  %v572_v48 = vld [vmem:[#allocation8 + $0x20] sm:$0xff] }
  0xa5   : > { %646 = vmatpush1.msra.mxu0 %v595_v25  ;;  %2569 = vmatpush3.msra.mxu1 %v597_v26  ;;  %v571_v49 = vld [vmem:[#allocation8 + $0x18] sm:$0xff]  ;;  %v573_v50 = vld [vmem:[#allocation8 + $0x28] sm:$0xff]  ;;  %v568_v52 = vld [vmem:[#allocation8] sm:$0xff] }
  0xa6   : > { %647 = vmatprep.subr.mxu0 %v593_v27  ;;  %2570 = vmatprep.subr.mxu1 %v3096_v4  ;;  %v569_v51 = vld [vmem:[#allocation8 + $0x8] sm:$0xff]  ;;  %v570_v53 = vld [vmem:[#allocation8 + $0x10] sm:$0xff]  ;;  %v2407_v58 = vld [vmem:[#allocation5] ss:$0 sm:$0xff] }
  0xa7   : > { %648 = vmatpush1.msra.mxu0 %v592_v28  ;;  %2571 = vmatpush3.msra.mxu1 %v594_v29  ;;  %v2408_v60 = vld [vmem:[#allocation7] ss:$0 sm:$0xff]  ;;  %v616_v3 = vld [vmem:[%s3583_s4] sm:$0x7] }
  0xa8   : > { %649 = vmatprep.subr.mxu0 %v590_v30  ;;  %2572 = vmatprep.subr.mxu1 %v3096_v4  ;;  %v625_v7 = vrot.slane %v616_v3, %v624_v2  ;;  %v621_v10 = vrot.slane %v616_v3, %v620_v5  ;;  %v629_v13 = vrot.slane %v616_v3, %v628_v6 }
  0xa9   : > { %650 = vmatpush1.msra.mxu0 %v589_v31  ;;  %2573 = vmatpush3.msra.mxu1 %v591_v32 }
  0xaa   : > { %651 = vmatprep.subr.mxu0 %v587_v33  ;;  %2574 = vmatprep.subr.mxu1 %v3096_v4 }
  0xab   : > { %652 = vmatpush1.msra.mxu0 %v586_v34  ;;  %2575 = vmatpush3.msra.mxu1 %v588_v35 }
  0xac   : > { %653 = vmatprep.subr.mxu0 %v584_v36  ;;  %2576 = vmatprep.subr.mxu1 %v3096_v4 }
  0xad   : > { %654 = vmatpush1.msra.mxu0 %v583_v37  ;;  %2577 = vmatpush3.msra.mxu1 %v585_v38 }
  0xae   : > { %655 = vmatprep.subr.mxu0 %v581_v39  ;;  %2578 = vmatprep.subr.mxu1 %v3096_v4 }
  0xaf   : > { %656 = vmatpush1.msra.mxu0 %v580_v40  ;;  %2579 = vmatpush3.msra.mxu1 %v582_v41  ;;  %v1112_v40 = vld [vmem:[#allocation10 + $0x38] sm:$0xff]  ;;  %v1111_v41 = vld [vmem:[#allocation10 + $0x30] sm:$0xff] }
  0xb0   : > { %657 = vmatprep.subr.mxu0 %v578_v42  ;;  %2580 = vmatprep.subr.mxu1 %v3096_v4  ;;  %v1110_v42 = vld [vmem:[#allocation10 + $0x28] sm:$0xff] }
  0xb1   : > { %658 = vmatpush1.msra.mxu0 %v577_v43  ;;  %2581 = vmatpush3.msra.mxu1 %v579_v44  ;;  %v1109_v43 = vld [vmem:[#allocation10 + $0x20] sm:$0xff] }
  0xb2   : > { %659 = vmatprep.subr.mxu0 %v575_v45  ;;  %2582 = vmatprep.subr.mxu1 %v3096_v4 }
  0xb3   : > { %660 = vmatpush1.msra.mxu0 %v574_v46  ;;  %2583 = vmatpush3.msra.mxu1 %v576_v47 }
  0xb4   : > { %661 = vmatprep.subr.mxu0 %v572_v48  ;;  %2584 = vmatprep.subr.mxu1 %v3096_v4  ;;  %v940_v48 = vld [vmem:[#allocation10 + $0x18] sm:$0xff] }
  0xb5   : > { %662 = vmatpush1.msra.mxu0 %v571_v49  ;;  %2585 = vmatpush3.msra.mxu1 %v573_v50  ;;  %v939_v49 = vld [vmem:[#allocation10 + $0x10] sm:$0xff]  ;;  %v938_v50 = vld [vmem:[#allocation10 + $0x8] sm:$0xff] }
  0xb6   : > { %663 = vmatprep.subr.mxu0 %v569_v51  ;;  %2586 = vmatprep.subr.mxu1 %v3096_v4  ;;  %v937_v51 = vld [vmem:[#allocation10] sm:$0xff] }
  0xb7   : > { %664 = vmatpush1.msra.mxu0 %v568_v52  ;;  %2587 = vmatpush3.msra.mxu1 %v570_v53 }
  0xb8   : > { %2588 = vmatprep.mubr.msk.f32.mxu1 %vm3097_vm0, %v3096_v4  ;;  %2591 = vmatprep.subr.mxu1 %v3096_v4 }
  0xb9   : > { %2601 = vmatprep.subr.mxu0 %v3096_v4 }
 0x120   : > { %v543_v14 = vpop.xlane.xlu0 %542 }
 0x121   : > { %v545_v15 = vmul.f32 0.0078125, %v543_v14 }
 0x123   : > { %v3370_v16 = vsub.f32 %v3360_v0, %v545_v15 }
 0x125   : > { %v547_v17 = vmul.f32 %v3370_v16, %v3370_v16 }
 0x127   : > { %548 = vadd.xlane.f32.xlu0 %v547_v17 }
 0x1b0   : > { %v549_v54 = vpop.xlane.xlu0 %548 }
 0x1b1   : > { %v550_v55 = vmul.f32 0.0078125, %v549_v54 }
 0x1b3   : > { %v551_v56 = vadd.f32 1e-06, %v550_v55 }
 0x1b5   : > { %2793 = vrsqrt.f32 %v551_v56 }
 0x1c2   : > { %v2794_v57 = vpop.eup %2793 }
 0x1c3   : > { %v553_v59 = vmul.f32 %v2794_v57, %v3370_v16 }
 0x1c5   : > { %v560_v61 = vmul.f32 %v2407_v58, %v553_v59 }
 0x1c7   : > { %v567_v62 = vadd.f32 %v2408_v60, %v560_v61 }
 0x1c9   : > { %698 = vmatmul.mubr.f32.vlgmr.msra.gmra.mxu0 %v567_v62  ;;  %2589 = vmatmul.mubr.f32.vlgmr.msra.gmra.mxu1 %v567_v62 }
 0x1ca   : > { %2593 = vmatprep.mubr.msk.f32.mxu1 %vm3097_vm0, %v3096_v4  ;;  %2603 = vmatprep.mubr.msk.f32.mxu0 %vm3097_vm0, %v3096_v4 }
 0x289   : > { %v699_v8 = vpop.f32.mrf.mxu0  ;;  %v770_v9 = vpop.f32.mrf.mxu1 }
 0x28a   : > { %v3414_v15 = vadd.f32 %v699_v8, %v621_v10  ;;  %v3417_v16 = vadd.f32 %v770_v9, %v629_v13 }
 0x28b   : > { %v701_v11 = vpop.f32.mrf.mxu0  ;;  %v2590_v12 = vpop.f32.mrf.mxu1 }
 0x28c   : > { %v3408_v14 = vadd.f32 %v701_v11, %v625_v7 }
 0x28e   : > { %943 = vrot.lane.b32.xlu1 %v3408_v14, %s3098_s9  ;;  %2592 = vmatpush3.xpose.msk.msra.mxu1 %vm774_vm1, %v3408_v14 }
 0x28f   : > { %2596 = vmatprep.subr.mxu1 %v3096_v4 }
 0x291   : > { %2594 = vmatmul.mubr.msk.f32.vlgmr.msra.gmra.mxu1 %vm774_vm1, %v3414_v15 }
 0x292   : > { %941 = vrot.lane.b32.xlu1 %v3414_v15, %s3098_s9  ;;  %2597 = vmatpush3.msra.mxu1 %v3417_v16 }
 0x293   : > { %2598 = vmatprep.mubr.msk.f32.mxu1 %vm3097_vm0, %v3096_v4  ;;  %2606 = vmatprep.subr.mxu1 %v3096_v4 }
 0x300   : > { %v944_v17 = vpop.permute.xlu1 %943 }
 0x301   : > { %2602 = vmatpush3.xpose.msk.msra.mxu0 %vm774_vm1, %v944_v17  ;;  %v1429_v17 = vld [vmem:[#allocation10 + $0x58] sm:$0xff] }
 0x302   : > { %2611 = vmatprep.subr.mxu0 %v3096_v4 }
 0x304   : > { %v942_v18 = vpop.permute.xlu1 %941 }
 0x305   : > { %2604 = vmatmul.mubr.msk.f32.vlgmr.msra.gmra.mxu0 %vm774_vm1, %v942_v18  ;;  %v1428_v18 = vld [vmem:[#allocation10 + $0x50] sm:$0xff] }
 0x306   : > { %2619 = vmatprep.mubr.msk.f32.mxu0 %vm3097_vm0, %v3096_v4  ;;  %2612 = vmatpush3.msra.mxu0 %v1112_v40 }
 0x307   : > { %2613 = vmatprep.subr.mxu0 %v3096_v4 }
 0x308   : > { %2614 = vmatpush3.msra.mxu0 %v1111_v41 }
 0x309   : > { %2615 = vmatprep.subr.mxu0 %v3096_v4 }
 0x30a   : > { %2616 = vmatpush3.msra.mxu0 %v1110_v42 }
 0x30b   : > { %2617 = vmatprep.subr.mxu0 %v3096_v4 }
 0x30c   : > { %2618 = vmatpush3.msra.mxu0 %v1109_v43 }
 0x30d   : > { %2633 = vmatprep.subr.mxu0 %v3096_v4 }
 0x351   : > { %v847_v19 = vpop.f32.mrf.mxu1 }
 0x352   : > { %v851_v20 = vmul.f32 0.17677669, %v847_v19 }
 0x353   : > { %v2595_v21 = vpop.f32.mrf.mxu1 }
 0x354   : > { %v853_v22 = vsel %vm852_vm2, %v851_v20, -inf }
 0x355   : > { %854 = vmax.xlane.f32.xlu0 %v853_v22 }
 0x3c5   : > { %v1015_v23 = vpop.f32.mrf.mxu0 }
 0x3c6   : > { %v1019_v24 = vmul.f32 0.17677669, %v1015_v23  ;;  %v1426_v23 = vld [vmem:[#allocation10 + $0x40] sm:$0xff] }
 0x3c7   : > { %v2605_v25 = vpop.f32.mrf.mxu0 }
 0x3c8   : > { %v1020_v26 = vsel %vm852_vm2, %v1019_v24, -inf }
 0x3c9   : > { %1021 = vmax.xlane.f32.xlu1 %v1020_v26 }
 0x3da   : > { %1259 = vrot.lane.b32.xlu1 %v3414_v15, %s3099_s15 }
 0x3de   : > { %v855_v27 = vpop.xlane.xlu0 %854 }
 0x3df   : > { %v856_v28 = vsub.f32 %v851_v20, %v855_v27 }
 0x3e1   : > { %v857_v29 = vmul.f32 1.442695, %v856_v28 }
 0x3e3   : > { %2795 = vpow2.f32 %v857_v29 }
 0x3f0   : > { %v2796_v30 = vpop.eup %2795 }
 0x3f1   : > { %v859_v31 = vsel %vm852_vm2, %v2796_v30, 0.0 }
 0x3f2   : > { %860 = vadd.xlane.f32.xlu0 %v859_v31 }
 0x452   : > { %v1022_v32 = vpop.xlane.xlu1 %1021 }
 0x453   : > { %v1023_v33 = vsub.f32 %v1019_v24, %v1022_v32 }
 0x455   : > { %v1024_v34 = vmul.f32 1.442695, %v1023_v33 }
 0x456   : > { %v1260_v57 = vpop.permute.xlu1 %1259 }
 0x457   : > { %2797 = vpow2.f32 %v1024_v34 }
 0x464   : > { %v2798_v35 = vpop.eup %2797 }
 0x465   : > { %v1026_v36 = vsel %vm852_vm2, %v2798_v35, 0.0 }
 0x466   : > { %1027 = vadd.xlane.f32.xlu0 %v1026_v36  ;;  %v1674_v36 = vld [vmem:[#allocation10 + $0x78] sm:$0xff] }
 0x47b   : > { %v861_v37 = vpop.xlane.xlu0 %860 }
 0x47c   : > { %2799 = vrcp.f32 %v861_v37  ;;  %1032 = vrot.lane.b32.xlu0 %v3417_v16, %s3098_s9  ;;  %v1673_v37 = vld [vmem:[#allocation10 + $0x70] sm:$0xff]  ;;  %s538_s9 = scalar_lea.vmem [#allocation14], %s2399_s1  ;;  %s3011_s1 = scalar_lea.vmem %s3010_s14, 256 }
 0x480   : > { %1261 = vrot.lane.b32.xlu0 %v3408_v14, %s3099_s15 }
 0x489   : > { %v2800_v38 = vpop.eup %2799 }
 0x48a   : > { %v863_v39 = vmul.f32 %v2800_v38, %v2796_v30 }
 0x48c   : > { %2599 = vmatmul.mubr.msk.f32.vlgmr.msra.gmra.mxu1 %vm852_vm2, %v863_v39 }
 0x48d   : > { %2608 = vmatprep.mubr.msk.f32.mxu1 %vm3097_vm0, %v3096_v4 }
 0x4ef   : > { %v1028_v44 = vpop.xlane.xlu0 %1027 }
 0x4f0   : > { %2801 = vrcp.f32 %v1028_v44 }
 0x4f3   : > { %v1033_v45 = vpop.permute.xlu0 %1032 }
 0x4f4   : > { %2607 = vmatpush3.msra.mxu1 %v1033_v45  ;;  %v1671_v45 = vld [vmem:[#allocation10 + $0x60] sm:$0xff] }
 0x4f5   : > { %2622 = vmatprep.subr.mxu1 %v3096_v4 }
 0x4f7   : > { %v1262_v55 = vpop.permute.xlu0 %1261 }
 0x4fd   : > { %v2802_v46 = vpop.eup %2801 }
 0x4fe   : > { %v1030_v47 = vmul.f32 %v2802_v46, %v2798_v35 }
 0x500   : > { %2609 = vmatmul.mubr.msk.f32.vlgmr.msra.gmra.mxu1 %vm852_vm2, %v1030_v47 }
 0x501   : > { %2623 = vmatpush3.msra.mxu1 %v940_v48  ;;  %2630 = vmatprep.mubr.msk.f32.mxu1 %vm3097_vm0, %v3096_v4 }
 0x502   : > { %2624 = vmatprep.subr.mxu1 %v3096_v4 }
 0x503   : > { %2625 = vmatpush3.msra.mxu1 %v939_v49 }
 0x504   : > { %2626 = vmatprep.subr.mxu1 %v3096_v4 }
 0x505   : > { %2627 = vmatpush3.msra.mxu1 %v938_v50 }
 0x506   : > { %2628 = vmatprep.subr.mxu1 %v3096_v4 }
 0x507   : > { %2629 = vmatpush3.msra.mxu1 %v937_v51  ;;  %v2425_v51 = vld [vmem:[%s3585_s6] ss:$0 sm:$0xff] }
 0x508   : > { %2638 = vmatprep.subr.mxu1 %v3096_v4 }
 0x54c   : > { %v933_v52 = vpop.f32.mrf.mxu1 }
 0x54d   : > { %2631 = vmatmul.mubr.msk.f32.vlgmr.msra.gmra.mxu1 %vm774_vm1, %v933_v52 }
 0x54e   : > { %v2600_v53 = vpop.f32.mrf.mxu1  ;;  %2640 = vmatprep.mubr.msk.f32.mxu1 %vm3097_vm0, %v3096_v4 }
 0x5c0   : > { %v1104_v54 = vpop.f32.mrf.mxu1 }
 0x5c1   : > { %2620 = vmatmul.mubr.msk.f32.vlgmr.msra.gmra.mxu0 %vm774_vm1, %v1104_v54  ;;  %v1846_v54 = vld [vmem:[#allocation11 + $0x1e8] sm:$0xff] }
 0x5c2   : > { %2634 = vmatpush3.xpose.msk.msra.mxu0 %vm774_vm1, %v1262_v55  ;;  %v2610_v56 = vpop.f32.mrf.mxu1  ;;  %2635 = vmatprep.mubr.msk.f32.mxu0 %vm3097_vm0, %v3096_v4  ;;  %v1848_v55 = vld [vmem:[#allocation11 + $0x1f8] sm:$0xff] }
 0x5c3   : > { %2643 = vmatprep.subr.mxu0 %v3096_v4  ;;  %v1845_v56 = vld [vmem:[#allocation11 + $0x1e0] sm:$0xff] }
 0x5c5   : > { %2636 = vmatmul.mubr.msk.f32.vlgmr.msra.gmra.mxu0 %vm774_vm1, %v1260_v57  ;;  %v1847_v57 = vld [vmem:[#allocation11 + $0x1f0] sm:$0xff] }
 0x5c6   : > { %2651 = vmatprep.mubr.msk.f32.mxu0 %vm3097_vm0, %v3096_v4  ;;  %2644 = vmatpush3.msra.mxu0 %v1429_v17  ;;  %v1830_v17 = vld [vmem:[#allocation11 + $0x168] sm:$0xff] }
 0x5c7   : > { %2645 = vmatprep.subr.mxu0 %v3096_v4 }
 0x5c8   : > { %2646 = vmatpush3.msra.mxu0 %v1428_v18  ;;  %v1832_v18 = vld [vmem:[#allocation11 + $0x178] sm:$0xff] }
 0x5c9   : > { %2647 = vmatprep.subr.mxu0 %v3096_v4 }
 0x60d   : > { %v3468_v58 = vpop.f32.mrf.mxu1 }
 0x60f   : > { %v2632_v59 = vpop.f32.mrf.mxu1 }
 0x610   : > { %v1841_v59 = vld [vmem:[#allocation11 + $0x1c0] sm:$0xff] }
 0x681   : > { %v3470_v60 = vpop.f32.mrf.mxu0 }
 0x682   : > { %v1256_v38 = vadd.f32 %v3468_v58, %v3470_v60  ;;  %v1844_v58 = vld [vmem:[#allocation11 + $0x1d8] sm:$0xff]  ;;  %v1843_v60 = vld [vmem:[#allocation11 + $0x1d0] sm:$0xff] }
 0x683   : > { %v2621_v61 = vpop.f32.mrf.mxu0 }
 0x684   : > { %v1838_v61 = vld [vmem:[#allocation11 + $0x1a8] sm:$0xff] }
 0x685   : > { %v1333_v62 = vpop.f32.mrf.mxu0 }
 0x686   : > { %v1337_v63 = vmul.f32 0.17677669, %v1333_v62  ;;  %v1837_v62 = vld [vmem:[#allocation11 + $0x1a0] sm:$0xff] }
 0x687   : > { %v2637_v3 = vpop.f32.mrf.mxu0 }
 0x688   : > { %v1338_v7 = vsel %vm852_vm2, %v1337_v63, -inf  ;;  %v1834_v3 = vld [vmem:[#allocation11 + $0x188] sm:$0xff] }
 0x689   : > { %1339 = vmax.xlane.f32.xlu0 %v1338_v7  ;;  %v1836_v7 = vld [vmem:[#allocation11 + $0x198] sm:$0xff] }
 0x69f   : > { %1349 = vrot.lane.b32.xlu0 %v3417_v16, %s3099_s15  ;;  %s2260_s15 = sshll.u32 %s538_s9, 4  ;;  %s2261_s15 = int_to_ptr.vmem [resolvable:$true] %s2260_s15 }
 0x6a0   : > { %s3005_s24 = scalar_lea.vmem %s2261_s15, 128  ;;  %p3012_p5 = scmp.lt.s32.totalorder %s2261_s15, %s3010_s14 }
 0x6a1   : > { %p3006_p12 = scmp.ne.s32.totalorder %s2261_s15, %s3005_s24  ;;  %p3013_p8 = scmp.lt.s32.totalorder %s3011_s1, %s3005_s24 }
 0x6a3   : > { %1504 = vrot.lane.b32.xlu0 %v3414_v15, %s3100_s3  ;;  %v1427_v15 = vld [vmem:[#allocation10 + $0x48] sm:$0xff]  ;;  %p3007_p0 = pnand %p3006_p12, %p3629_p13  ;;  %p3014_p9 = por %p3013_p8, %p3012_p5 }
 0x6a4   : > { %2648 = vmatpush3.msra.mxu0 %v1427_v15  ;;  %v1829_v15 = vld [vmem:[#allocation11 + $0x160] sm:$0xff] }
 0x6a5   : > { %2649 = vmatprep.subr.mxu0 %v3096_v4  ;;  %p3008_p2 = pneg %p3007_p0 }
 0x6a6   : > { %2650 = vmatpush3.msra.mxu0 %v1426_v23  ;;  %v1822_v23 = vld [vmem:[#allocation11 + $0x128] sm:$0xff] }
 0x6a7   : > { %2664 = vmatprep.subr.mxu0 %v3096_v4  ;;  %p3015_p4 = pnand %p3014_p9, %p3008_p2 }
 0x712   : > { %v1340_v8 = vpop.xlane.xlu0 %1339 }
 0x713   : > { %v1341_v9 = vsub.f32 %v1337_v63, %v1340_v8  ;;  %v1839_v63 = vld [vmem:[#allocation11 + $0x1b0] sm:$0xff]  ;;  %v1833_v8 = vld [vmem:[#allocation11 + $0x180] sm:$0xff] }
 0x715   : > { %v1342_v10 = vmul.f32 1.442695, %v1341_v9  ;;  %v1835_v9 = vld [vmem:[#allocation11 + $0x190] sm:$0xff] }
 0x716   : > { %v1350_v11 = vpop.permute.xlu0 %1349 }
 0x717   : > { %2803 = vpow2.f32 %v1342_v10  ;;  %2639 = vmatpush3.msra.mxu1 %v1350_v11 }
 0x718   : > { %2654 = vmatprep.subr.mxu1 %v3096_v4 }
 0x724   : > { %v2804_v12 = vpop.eup %2803 }
 0x725   : > { %v1344_v13 = vsel %vm852_vm2, %v2804_v12, 0.0 }
 0x726   : > { %1345 = vadd.xlane.f32.xlu1 %v1344_v13 }
 0x737   : > { %1506 = vrot.lane.b32.xlu1 %v3408_v14, %s3100_s3  ;;  %v1505_v14 = vpop.permute.xlu0 %1504 }
 0x7af   : > { %v1346_v19 = vpop.xlane.xlu1 %1345 }
 0x7b0   : > { %2805 = vrcp.f32 %v1346_v19  ;;  %v1831_v19 = vld [vmem:[#allocation11 + $0x170] sm:$0xff] }
 0x7b3   : > { %v1507_v22 = vpop.permute.xlu1 %1506 }
 0x7bd   : > { %v2806_v20 = vpop.eup %2805 }
 0x7be   : > { %v1348_v21 = vmul.f32 %v2806_v20, %v2804_v12  ;;  %v1826_v20 = vld [vmem:[#allocation11 + $0x148] sm:$0xff] }
 0x7c0   : > { %2641 = vmatmul.mubr.msk.f32.vlgmr.msra.gmra.mxu1 %vm852_vm2, %v1348_v21  ;;  %v1828_v21 = vld [vmem:[#allocation11 + $0x158] sm:$0xff] }
 0x7c1   : > { %2655 = vmatpush3.xpose.msk.msra.mxu1 %vm774_vm1, %v1507_v22  ;;  %2656 = vmatprep.mubr.msk.f32.mxu1 %vm3097_vm0, %v3096_v4  ;;  %v1825_v22 = vld [vmem:[#allocation11 + $0x140] sm:$0xff] }
 0x7c2   : > { %2659 = vmatprep.subr.mxu1 %v3096_v4 }
 0x7c4   : > { %2657 = vmatmul.mubr.msk.f32.vlgmr.msra.gmra.mxu1 %vm774_vm1, %v1505_v14  ;;  %v1827_v14 = vld [vmem:[#allocation11 + $0x150] sm:$0xff] }
 0x7c5   : > { %2661 = vmatprep.mubr.msk.f32.mxu1 %vm3097_vm0, %v3096_v4 }
 0x880   : > { %v1421_v24 = vpop.f32.mrf.mxu1 }
 0x881   : > { %2652 = vmatmul.mubr.msk.f32.vlgmr.msra.gmra.mxu0 %vm774_vm1, %v1421_v24  ;;  %v1824_v24 = vld [vmem:[#allocation11 + $0x138] sm:$0xff] }
 0x882   : > { %v2642_v25 = vpop.f32.mrf.mxu1  ;;  %2672 = vmatprep.mubr.msk.f32.mxu0 %vm3097_vm0, %v3096_v4  ;;  %2665 = vmatpush3.msra.mxu0 %v1674_v36  ;;  %v1812_v36 = vld [vmem:[#allocation11 + $0xd8] sm:$0xff] }
 0x883   : > { %2666 = vmatprep.subr.mxu0 %v3096_v4  ;;  %v1821_v25 = vld [vmem:[#allocation11 + $0x120] sm:$0xff] }
 0x884   : > { %v1578_v26 = vpop.f32.mrf.mxu1  ;;  %2667 = vmatpush3.msra.mxu0 %v1673_v37  ;;  %v1809_v37 = vld [vmem:[#allocation11 + $0xc0] sm:$0xff] }
 0x885   : > { %v1582_v27 = vmul.f32 0.17677669, %v1578_v26  ;;  %2668 = vmatprep.subr.mxu0 %v3096_v4  ;;  %v1823_v26 = vld [vmem:[#allocation11 + $0x130] sm:$0xff] }
 0x886   : > { %v2658_v28 = vpop.f32.mrf.mxu1 }
 0x887   : > { %v1583_v29 = vsel %vm852_vm2, %v1582_v27, -inf  ;;  %v1820_v28 = vld [vmem:[#allocation11 + $0x118] sm:$0xff] }
 0x888   : > { %1584 = vmax.xlane.f32.xlu0 %v1583_v29  ;;  %v1817_v29 = vld [vmem:[#allocation11 + $0x100] sm:$0xff] }
 0x89e   : > { %1594 = vrot.lane.b32.xlu0 %v3417_v16, %s3100_s3  ;;  %v1672_v16 = vld [vmem:[#allocation10 + $0x68] sm:$0xff] }
 0x89f   : > { %2669 = vmatpush3.msra.mxu0 %v1672_v16  ;;  %v1808_v16 = vld [vmem:[#allocation11 + $0xb8] sm:$0xff] }
 0x8a0   : > { %2670 = vmatprep.subr.mxu0 %v3096_v4 }
 0x8a1   : > { %2671 = vmatpush3.msra.mxu0 %v1671_v45  ;;  %v1803_v45 = vld [vmem:[#allocation11 + $0x90] sm:$0xff] }
 0x8a2   : > { %1942 = vmatprep.subr.mxu0 %v1848_v55  ;;  %v1790_v55 = vld [vmem:[#allocation11 + $0x28] sm:$0xff] }
 0x911   : > { %v1585_v30 = vpop.xlane.xlu0 %1584 }
 0x912   : > { %v1586_v31 = vsub.f32 %v1582_v27, %v1585_v30  ;;  %v1818_v27 = vld [vmem:[#allocation11 + $0x108] sm:$0xff]  ;;  %v1819_v30 = vld [vmem:[#allocation11 + $0x110] sm:$0xff] }
 0x914   : > { %v1587_v32 = vmul.f32 1.442695, %v1586_v31  ;;  %v1814_v31 = vld [vmem:[#allocation11 + $0xe8] sm:$0xff] }
 0x915   : > { %v1595_v33 = vpop.permute.xlu0 %1594 }
 0x916   : > { %2807 = vpow2.f32 %v1587_v32  ;;  %2660 = vmatpush3.msra.mxu1 %v1595_v33  ;;  %v1816_v32 = vld [vmem:[#allocation11 + $0xf8] sm:$0xff]  ;;  %v1813_v33 = vld [vmem:[#allocation11 + $0xe0] sm:$0xff] }
 0x917   : > { %1871 = vmatprep.subr.mxu1 %v1846_v54  ;;  %v1795_v54 = vld [vmem:[#allocation11 + $0x50] sm:$0xff] }
 0x923   : > { %v2808_v34 = vpop.eup %2807 }
 0x924   : > { %v1589_v35 = vsel %vm852_vm2, %v2808_v34, 0.0 }
 0x925   : > { %1590 = vadd.xlane.f32.xlu1 %v1589_v35  ;;  %v1810_v35 = vld [vmem:[#allocation11 + $0xc8] sm:$0xff] }
 0x941   : > { %v1499_v39 = vpop.f32.mrf.mxu0 }
 0x942   : > { %v1503_v40 = vadd.f32 %v1499_v39, %v1256_v38  ;;  %v1811_v38 = vld [vmem:[#allocation11 + $0xd0] sm:$0xff]  ;;  %v1806_v39 = vld [vmem:[#allocation11 + $0xa8] sm:$0xff] }
 0x943   : > { %v2653_v41 = vpop.f32.mrf.mxu0 }
 0x944   : > { %v1807_v41 = vld [vmem:[#allocation11 + $0xb0] sm:$0xff] }
 0x9ae   : > { %v1591_v42 = vpop.xlane.xlu1 %1590 }
 0x9af   : > { %2809 = vrcp.f32 %v1591_v42  ;;  %v1802_v42 = vld [vmem:[#allocation11 + $0x88] sm:$0xff] }
 0x9bc   : > { %v2810_v43 = vpop.eup %2809 }
 0x9bd   : > { %v1593_v44 = vmul.f32 %v2810_v43, %v2808_v34  ;;  %v1815_v34 = vld [vmem:[#allocation11 + $0xf0] sm:$0xff]  ;;  %v1804_v43 = vld [vmem:[#allocation11 + $0x98] sm:$0xff] }
 0x9bf   : > { %2662 = vmatmul.mubr.msk.f32.vlgmr.msra.gmra.mxu1 %vm852_vm2, %v1593_v44  ;;  %v1801_v44 = vld [vmem:[#allocation11 + $0x80] sm:$0xff] }
 0x9c0   : > { %1935 = vmatprep.mubr.f32.mxu1 %v3096_v4  ;;  %1872 = vmatpush1.msra.mxu1 %v1845_v56  ;;  %v1792_v56 = vld [vmem:[#allocation11 + $0x38] sm:$0xff] }
 0xa7f   : > { %v1666_v46 = vpop.f32.mrf.mxu1 }
 0xa80   : > { %2673 = vmatmul.mubr.msk.f32.vlgmr.msra.gmra.mxu0 %vm774_vm1, %v1666_v46  ;;  %v1798_v46 = vld [vmem:[#allocation11 + $0x68] sm:$0xff] }
 0xa81   : > { %v2663_v47 = vpop.f32.mrf.mxu1  ;;  %2006 = vmatprep.mubr.f32.mxu0 %v3096_v4  ;;  %v1842_v4 = vld [vmem:[#allocation11 + $0x1c8] sm:$0xff]  ;;  %1943 = vmatpush1.msra.mxu0 %v1847_v57  ;;  %v1789_v57 = vld [vmem:[#allocation11 + $0x20] sm:$0xff] }
 0xa82   : > { %1873 = vmatprep.subr.mxu1 %v1842_v4  ;;  %1944 = vmatprep.subr.mxu0 %v1844_v58  ;;  %v1800_v47 = vld [vmem:[#allocation11 + $0x78] sm:$0xff]  ;;  %v1791_v4 = vld [vmem:[#allocation11 + $0x30] sm:$0xff]  ;;  %v1786_v58 = vld [vmem:[#allocation11 + $0x8] sm:$0xff] }
 0xa83   : > { %1874 = vmatpush1.msra.mxu1 %v1841_v59  ;;  %1945 = vmatpush1.msra.mxu0 %v1843_v60  ;;  %v1788_v59 = vld [vmem:[#allocation11 + $0x18] sm:$0xff]  ;;  %v1785_v60 = vld [vmem:[#allocation11] sm:$0xff] }
 0xa84   : > { %1875 = vmatprep.subr.mxu1 %v1838_v61  ;;  %v1787_v61 = vld [vmem:[#allocation11 + $0x10] sm:$0xff] }
 0xa85   : > { %1876 = vmatpush1.msra.mxu1 %v1837_v62  ;;  %v2096_v62 = vld [vmem:[#allocation13 + $0x1f8] sm:$0xff] }
 0xa86   : > { %1877 = vmatprep.subr.mxu1 %v1834_v3 }
 0xa87   : > { %1878 = vmatpush1.msra.mxu1 %v1833_v8 }
 0xa88   : > { %1879 = vmatprep.subr.mxu1 %v1830_v17 }
 0xa89   : > { %1880 = vmatpush1.msra.mxu1 %v1829_v15  ;;  %v2080_v15 = vld [vmem:[#allocation13 + $0x178] sm:$0xff] }
 0xa8a   : > { %1881 = vmatprep.subr.mxu1 %v1826_v20  ;;  %v2095_v20 = vld [vmem:[#allocation13 + $0x1f0] sm:$0xff] }
 0xa8b   : > { %1882 = vmatpush1.msra.mxu1 %v1825_v22  ;;  %v2079_v22 = vld [vmem:[#allocation13 + $0x170] sm:$0xff] }
 0xa8c   : > { %1883 = vmatprep.subr.mxu1 %v1822_v23  ;;  %v2094_v23 = vld [vmem:[#allocation13 + $0x1e8] sm:$0xff] }
 0xa8d   : > { %1884 = vmatpush1.msra.mxu1 %v1821_v25  ;;  %v2061_v25 = vld [vmem:[#allocation13 + $0xe0] sm:$0xff] }
 0xa8e   : > { %1885 = vmatprep.subr.mxu1 %v1818_v27  ;;  %v2045_v27 = vld [vmem:[#allocation13 + $0x60] sm:$0xff] }
 0xa8f   : > { %1886 = vmatpush1.msra.mxu1 %v1817_v29  ;;  %v2060_v29 = vld [vmem:[#allocation13 + $0xd8] sm:$0xff] }
 0xa90   : > { %1887 = vmatprep.subr.mxu1 %v1814_v31  ;;  %v2044_v31 = vld [vmem:[#allocation13 + $0x58] sm:$0xff] }
 0xa91   : > { %1888 = vmatpush1.msra.mxu1 %v1813_v33  ;;  %v2059_v33 = vld [vmem:[#allocation13 + $0xd0] sm:$0xff] }
 0xa92   : > { %1889 = vmatprep.subr.mxu1 %v1810_v35  ;;  %v2043_v35 = vld [vmem:[#allocation13 + $0x50] sm:$0xff] }
 0xa93   : > { %1890 = vmatpush1.msra.mxu1 %v1809_v37  ;;  %v2058_v37 = vld [vmem:[#allocation13 + $0xc8] sm:$0xff] }
 0xa94   : > { %1891 = vmatprep.subr.mxu1 %v1806_v39  ;;  %v2042_v39 = vld [vmem:[#allocation13 + $0x48] sm:$0xff] }
 0xb40   : > { %v1744_v48 = vpop.f32.mrf.mxu0 }
 0xb41   : > { %v1748_v49 = vadd.f32 %v1744_v48, %v1503_v40  ;;  %v1805_v40 = vld [vmem:[#allocation11 + $0xa0] sm:$0xff] }
 0xb42   : > { %v2674_v50 = vpop.f32.mrf.mxu0  ;;  %1892 = vmatpush1.msra.mxu1 %v1805_v40  ;;  %v1797_v48 = vld [vmem:[#allocation11 + $0x60] sm:$0xff] }
 0xb43   : > { %v1749_v52 = vadd.f32 %v1748_v49, %v3360_v0  ;;  %v1840_v0 = vld [vmem:[#allocation11 + $0x1b8] sm:$0xff]  ;;  %1893 = vmatprep.subr.mxu1 %v1802_v42  ;;  %v1799_v49 = vld [vmem:[#allocation11 + $0x70] sm:$0xff]  ;;  %v1794_v50 = vld [vmem:[#allocation11 + $0x48] sm:$0xff] }
 0xb44   : > { %1946 = vmatprep.subr.mxu0 %v1840_v0  ;;  %1894 = vmatpush1.msra.mxu1 %v1801_v44  ;;  %v2064_v0 = vld [vmem:[#allocation13 + $0xf8] sm:$0xff]  ;;  %v2057_v40 = vld [vmem:[#allocation13 + $0xc0] sm:$0xff] }
 0xb45   : > { %v3513_v53 = vadd.f32 %v2425_v51, %v1749_v52  ;;  %1947 = vmatpush1.msra.mxu0 %v1839_v63  ;;  %v1796_v51 = vld [vmem:[#allocation11 + $0x58] sm:$0xff]  ;;  %1895 = vmatprep.subr.mxu1 %v1798_v46  ;;  %v1793_v52 = vld [vmem:[#allocation11 + $0x40] sm:$0xff] }
 0xb46   : > { %1948 = vmatprep.subr.mxu0 %v1836_v7  ;;  %1896 = vmatpush1.msra.mxu1 %v1797_v48  ;;  %v2041_v42 = vld [vmem:[#allocation13 + $0x40] sm:$0xff]  ;;  %v2056_v44 = vld [vmem:[#allocation13 + $0xb8] sm:$0xff]  ;;  %v2055_v48 = vld [vmem:[#allocation13 + $0xb0] sm:$0xff] }
 0xb47   : > { %1760 = vadd.xlane.f32.xlu1 %v3513_v53  ;;  %1949 = vmatpush1.msra.mxu0 %v1835_v9  ;;  %v2426_v9 = vld [vmem:[%s3586_s7] ss:$0 sm:$0xff]  ;;  %v2040_v46 = vld [vmem:[#allocation13 + $0x38] sm:$0xff] }
 0xb48   : > { %1950 = vmatprep.subr.mxu0 %v1832_v18  ;;  %1897 = vmatprep.subr.mxu1 %v1794_v50  ;;  %v2048_v18 = vld [vmem:[#allocation13 + $0x78] sm:$0xff]  ;;  %v2039_v50 = vld [vmem:[#allocation13 + $0x30] sm:$0xff] }
 0xb49   : > { %1951 = vmatpush1.msra.mxu0 %v1831_v19  ;;  %1898 = vmatpush1.msra.mxu1 %v1793_v52  ;;  %v2063_v19 = vld [vmem:[#allocation13 + $0xf0] sm:$0xff]  ;;  %v2054_v52 = vld [vmem:[#allocation13 + $0xa8] sm:$0xff] }
 0xb4a   : > { %1952 = vmatprep.subr.mxu0 %v1828_v21  ;;  %1899 = vmatprep.subr.mxu1 %v1790_v55  ;;  %v2047_v21 = vld [vmem:[#allocation13 + $0x70] sm:$0xff]  ;;  %v2038_v55 = vld [vmem:[#allocation13 + $0x28] sm:$0xff] }
 0xb4b   : > { %1953 = vmatpush1.msra.mxu0 %v1827_v14  ;;  %1900 = vmatpush1.msra.mxu1 %v1789_v57  ;;  %v2062_v14 = vld [vmem:[#allocation13 + $0xe8] sm:$0xff]  ;;  %v2053_v57 = vld [vmem:[#allocation13 + $0xa0] sm:$0xff] }
 0xb4c   : > { %1954 = vmatprep.subr.mxu0 %v1824_v24  ;;  %1901 = vmatprep.subr.mxu1 %v1786_v58  ;;  %v2078_v24 = vld [vmem:[#allocation13 + $0x168] sm:$0xff]  ;;  %v2037_v58 = vld [vmem:[#allocation13 + $0x20] sm:$0xff] }
 0xb4d   : > { %1955 = vmatpush1.msra.mxu0 %v1823_v26  ;;  %1902 = vmatpush1.msra.mxu1 %v1785_v60  ;;  %v2093_v26 = vld [vmem:[#allocation13 + $0x1e0] sm:$0xff]  ;;  %v2052_v60 = vld [vmem:[#allocation13 + $0x98] sm:$0xff] }
 0xb4e   : > { %1956 = vmatprep.subr.mxu0 %v1820_v28  ;;  %2486 = vmatprep.subr.mxu1 %v2064_v0  ;;  %v2077_v28 = vld [vmem:[#allocation13 + $0x160] sm:$0xff]  ;;  %v2036_v0 = vld [vmem:[#allocation13 + $0x18] sm:$0xff] }
 0xb4f   : > { %1957 = vmatpush1.msra.mxu0 %v1819_v30  ;;  %v2092_v30 = vld [vmem:[#allocation13 + $0x1d8] sm:$0xff] }
 0xb50   : > { %1958 = vmatprep.subr.mxu0 %v1816_v32  ;;  %v2076_v32 = vld [vmem:[#allocation13 + $0x158] sm:$0xff] }
 0xb51   : > { %1959 = vmatpush1.msra.mxu0 %v1815_v34  ;;  %v2091_v34 = vld [vmem:[#allocation13 + $0x1d0] sm:$0xff] }
 0xb52   : > { %1960 = vmatprep.subr.mxu0 %v1812_v36  ;;  %v2075_v36 = vld [vmem:[#allocation13 + $0x150] sm:$0xff] }
 0xb53   : > { %1961 = vmatpush1.msra.mxu0 %v1811_v38  ;;  %v2090_v38 = vld [vmem:[#allocation13 + $0x1c8] sm:$0xff] }
 0xb54   : > { %1962 = vmatprep.subr.mxu0 %v1808_v16  ;;  %v2074_v16 = vld [vmem:[#allocation13 + $0x148] sm:$0xff] }
 0xb55   : > { %1963 = vmatpush1.msra.mxu0 %v1807_v41  ;;  %v2089_v41 = vld [vmem:[#allocation13 + $0x1c0] sm:$0xff] }
 0xb56   : > { %1964 = vmatprep.subr.mxu0 %v1804_v43  ;;  %v2073_v43 = vld [vmem:[#allocation13 + $0x140] sm:$0xff] }
 0xb57   : > { %1965 = vmatpush1.msra.mxu0 %v1803_v45  ;;  %v2088_v45 = vld [vmem:[#allocation13 + $0x1b8] sm:$0xff] }
 0xb58   : > { %1966 = vmatprep.subr.mxu0 %v1800_v47  ;;  %v2072_v47 = vld [vmem:[#allocation13 + $0x138] sm:$0xff] }
 0xb59   : > { %1967 = vmatpush1.msra.mxu0 %v1799_v49  ;;  %v2087_v49 = vld [vmem:[#allocation13 + $0x1b0] sm:$0xff] }
 0xb5a   : > { %1968 = vmatprep.subr.mxu0 %v1796_v51  ;;  %v2071_v51 = vld [vmem:[#allocation13 + $0x130] sm:$0xff] }
 0xb5b   : > { %1969 = vmatpush1.msra.mxu0 %v1795_v54  ;;  %v2086_v54 = vld [vmem:[#allocation13 + $0x1a8] sm:$0xff] }
 0xb5c   : > { %1970 = vmatprep.subr.mxu0 %v1792_v56  ;;  %v2070_v56 = vld [vmem:[#allocation13 + $0x128] sm:$0xff] }
 0xb5d   : > { %1971 = vmatpush1.msra.mxu0 %v1791_v4  ;;  %v2085_v4 = vld [vmem:[#allocation13 + $0x1a0] sm:$0xff] }
 0xb5e   : > { %1972 = vmatprep.subr.mxu0 %v1788_v59  ;;  %v2069_v59 = vld [vmem:[#allocation13 + $0x120] sm:$0xff] }
 0xb5f   : > { %1973 = vmatpush1.msra.mxu0 %v1787_v61  ;;  %v2084_v61 = vld [vmem:[#allocation13 + $0x198] sm:$0xff] }
 0xb60   : > { %2521 = vmatprep.subr.mxu0 %v2096_v62  ;;  %v2068_v62 = vld [vmem:[#allocation13 + $0x118] sm:$0xff] }
 0xbd0   : > { %v1761_v10 = vpop.xlane.xlu1 %1760 }
 0xbd1   : > { %v1762_v11 = vmul.f32 0.0078125, %v1761_v10 }
 0xbd3   : > { %v3517_v12 = vsub.f32 %v3513_v53, %v1762_v11  ;;  %v2427_v11 = vld [vmem:[%s3587_s8] ss:$0 sm:$0xff] }
 0xbd5   : > { %v1764_v13 = vmul.f32 %v3517_v12, %v3517_v12 }
 0xbd7   : > { %1765 = vadd.xlane.f32.xlu1 %v1764_v13 }
 0xc60   : > { %v1766_v63 = vpop.xlane.xlu1 %1765 }
 0xc61   : > { %v1767_v3 = vmul.f32 0.0078125, %v1766_v63  ;;  %v2051_v63 = vld [vmem:[#allocation13 + $0x90] sm:$0xff] }
 0xc63   : > { %v1768_v7 = vadd.f32 1e-06, %v1767_v3  ;;  %v2083_v3 = vld [vmem:[#allocation13 + $0x190] sm:$0xff] }
 0xc65   : > { %2811 = vrsqrt.f32 %v1768_v7  ;;  %v2035_v7 = vld [vmem:[#allocation13 + $0x10] sm:$0xff] }
 0xc72   : > { %v2812_v8 = vpop.eup %2811 }
 0xc73   : > { %v1770_v10 = vmul.f32 %v2812_v8, %v3517_v12  ;;  %v2046_v12 = vld [vmem:[#allocation13 + $0x68] sm:$0xff]  ;;  %v2067_v8 = vld [vmem:[#allocation13 + $0x110] sm:$0xff] }
 0xc75   : > { %v1777_v13 = vmul.f32 %v2426_v9, %v1770_v10  ;;  %v2050_v9 = vld [vmem:[#allocation13 + $0x88] sm:$0xff] }
 0xc76   : > { %v2082_v10 = vld [vmem:[#allocation13 + $0x188] sm:$0xff] }
 0xc77   : > { %v1784_v17 = vadd.f32 %v2427_v11, %v1777_v13  ;;  %v2034_v11 = vld [vmem:[#allocation13 + $0x8] sm:$0xff] }
 0xc78   : > { %v2066_v13 = vld [vmem:[#allocation13 + $0x108] sm:$0xff] }
 0xc79   : > { %1936 = vmatmul.mubr.f32.vlgmr.msra.gmra.mxu1 %v1784_v17  ;;  %2007 = vmatmul.mubr.f32.vlgmr.msra.gmra.mxu0 %v1784_v17  ;;  %v2049_v17 = vld [vmem:[#allocation13 + $0x80] sm:$0xff] }
 0xc7a   : > { %2487 = vmatpush3.msra.mxu1 %v2048_v18  ;;  %2522 = vmatpush3.msra.mxu0 %v2080_v15  ;;  %v2081_v18 = vld [vmem:[#allocation13 + $0x180] sm:$0xff] }
 0xc7b   : > { %2488 = vmatprep.subr.mxu1 %v2063_v19  ;;  %2523 = vmatprep.subr.mxu0 %v2095_v20  ;;  %v2033_v15 = vld [vmem:[#allocation13] sm:$0xff]  ;;  %v1849_v20 = vld [vmem:[%s3589_s10] sm:$0xf] }
 0xc7c   : > { %2489 = vmatpush3.msra.mxu1 %v2047_v21  ;;  %2524 = vmatpush3.msra.mxu0 %v2079_v22  ;;  %v2065_v19 = vld [vmem:[#allocation13 + $0x100] sm:$0xff]  ;;  %v1865_v21 = vsub.s32 3, %v3394_v1  ;;  %v1854_v22 = vrot.slane %v1849_v20, %v620_v5 }
 0xc7d   : > { %2490 = vmatprep.subr.mxu1 %v2062_v14  ;;  %2525 = vmatprep.subr.mxu0 %v2094_v23  ;;  %v1862_v14 = vrot.slane %v1849_v20, %v628_v6 }
 0xc7e   : > { %2491 = vmatpush3.msra.mxu1 %v2046_v12  ;;  %2526 = vmatpush3.msra.mxu0 %v2078_v24  ;;  %v1858_v24 = vrot.slane %v1849_v20, %v624_v2 }
 0xc7f   : > { %2492 = vmatprep.subr.mxu1 %v2061_v25  ;;  %2527 = vmatprep.subr.mxu0 %v2093_v26  ;;  %v1866_v25 = vrot.slane %v1849_v20, %v1865_v21 }
 0xc80   : > { %2493 = vmatpush3.msra.mxu1 %v2045_v27  ;;  %2528 = vmatpush3.msra.mxu0 %v2077_v28 }
 0xc81   : > { %2494 = vmatprep.subr.mxu1 %v2060_v29  ;;  %2529 = vmatprep.subr.mxu0 %v2092_v30 }
 0xc82   : > { %2495 = vmatpush3.msra.mxu1 %v2044_v31  ;;  %2530 = vmatpush3.msra.mxu0 %v2076_v32 }
 0xc83   : > { %2496 = vmatprep.subr.mxu1 %v2059_v33  ;;  %2531 = vmatprep.subr.mxu0 %v2091_v34 }
 0xc84   : > { %2497 = vmatpush3.msra.mxu1 %v2043_v35  ;;  %2532 = vmatpush3.msra.mxu0 %v2075_v36 }
 0xc85   : > { %2498 = vmatprep.subr.mxu1 %v2058_v37  ;;  %2533 = vmatprep.subr.mxu0 %v2090_v38 }
 0xc86   : > { %2499 = vmatpush3.msra.mxu1 %v2042_v39  ;;  %2534 = vmatpush3.msra.mxu0 %v2074_v16 }
 0xc87   : > { %2500 = vmatprep.subr.mxu1 %v2057_v40  ;;  %2535 = vmatprep.subr.mxu0 %v2089_v41 }
 0xc88   : > { %2501 = vmatpush3.msra.mxu1 %v2041_v42  ;;  %2536 = vmatpush3.msra.mxu0 %v2073_v43 }
 0xc89   : > { %2502 = vmatprep.subr.mxu1 %v2056_v44  ;;  %2537 = vmatprep.subr.mxu0 %v2088_v45 }
 0xc8a   : > { %2503 = vmatpush3.msra.mxu1 %v2040_v46  ;;  %2538 = vmatpush3.msra.mxu0 %v2072_v47 }
 0xc8b   : > { %2504 = vmatprep.subr.mxu1 %v2055_v48  ;;  %2539 = vmatprep.subr.mxu0 %v2087_v49  ;;  %v2428_v49 = vld [vmem:[%s3591_s12] ss:$0 sm:$0xff] }
 0xc8c   : > { %2505 = vmatpush3.msra.mxu1 %v2039_v50  ;;  %2540 = vmatpush3.msra.mxu0 %v2071_v51 }
 0xc8d   : > { %2506 = vmatprep.subr.mxu1 %v2054_v52  ;;  %2541 = vmatprep.subr.mxu0 %v2086_v54 }
 0xc8e   : > { %2507 = vmatpush3.msra.mxu1 %v2038_v55  ;;  %2542 = vmatpush3.msra.mxu0 %v2070_v56 }
 0xc8f   : > { %2508 = vmatprep.subr.mxu1 %v2053_v57  ;;  %2543 = vmatprep.subr.mxu0 %v2085_v4 }
 0xc90   : > { %2509 = vmatpush3.msra.mxu1 %v2037_v58  ;;  %2544 = vmatpush3.msra.mxu0 %v2069_v59 }
 0xc91   : > { %2510 = vmatprep.subr.mxu1 %v2052_v60  ;;  %2545 = vmatprep.subr.mxu0 %v2084_v61 }
 0xc92   : > { %2511 = vmatpush3.msra.mxu1 %v2036_v0  ;;  %2546 = vmatpush3.msra.mxu0 %v2068_v62 }
 0xc93   : > { %2512 = vmatprep.subr.mxu1 %v2051_v63  ;;  %2547 = vmatprep.subr.mxu0 %v2083_v3 }
 0xc94   : > { %2513 = vmatpush3.msra.mxu1 %v2035_v7  ;;  %2548 = vmatpush3.msra.mxu0 %v2067_v8 }
 0xc95   : > { %2514 = vmatprep.subr.mxu1 %v2050_v9  ;;  %2549 = vmatprep.subr.mxu0 %v2082_v10 }
 0xc96   : > { %2515 = vmatpush3.msra.mxu1 %v2034_v11  ;;  %2550 = vmatpush3.msra.mxu0 %v2066_v13 }
 0xc97   : > { %2516 = vmatprep.subr.mxu1 %v2049_v17  ;;  %2551 = vmatprep.subr.mxu0 %v2081_v18 }
 0xc98   : > { %2517 = vmatpush3.msra.mxu1 %v2033_v15  ;;  %2552 = vmatpush3.msra.mxu0 %v2065_v19 }
 0xd39   : > { %v1937_v23 = vpop.f32.mrf.mxu1  ;;  %v2008_v12 = vpop.f32.mrf.mxu0 }
 0xd3a   : > { %v1938_v26 = vadd.f32 %v1937_v23, %v1854_v22  ;;  %v2009_v27 = vadd.f32 %v2008_v12, %v1862_v14 }
 0xd3b   : > { %v1939_v28 = vpop.f32.mrf.mxu1  ;;  %v2010_v29 = vpop.f32.mrf.mxu0 }
 0xd3c   : > { %v2017_v30 = vmul.f32 0.70710677, %v1938_v26  ;;  %v2019_v31 = vmul.f32 0.70710677, %v2009_v27  ;;  %v1940_v32 = vadd.f32 %v1939_v28, %v1858_v24  ;;  %v2011_v33 = vadd.f32 %v2010_v29, %v1866_v25 }
 0xd3d   : > { %v2013_v16 = vmul.f32 0.5, %v1938_v26  ;;  %v2015_v42 = vmul.f32 0.5, %v2009_v27 }
 0xd3e   : > { %2813 = verf.f32 %v2017_v30  ;;  %v2018_v5 = vmul.f32 0.70710677, %v1940_v32  ;;  %v2020_v34 = vmul.f32 0.70710677, %v2011_v33  ;;  %v2014_v38 = vmul.f32 0.5, %v1940_v32 }
 0xd3f   : > { %2815 = verf.f32 %v2019_v31  ;;  %v2016_v40 = vmul.f32 0.5, %v2011_v33 }
 0xd40   : > { %2817 = verf.f32 %v2018_v5 }
 0xd41   : > { %2819 = verf.f32 %v2020_v34 }
 0xd4b   : > { %v2814_v6 = vpop.eup %2813 }
 0xd4c   : > { %v2816_v35 = vpop.eup %2815  ;;  %v2025_v1 = vadd.f32 1.0, %v2814_v6 }
 0xd4d   : > { %v2818_v36 = vpop.eup %2817  ;;  %v2027_v37 = vadd.f32 1.0, %v2816_v35 }
 0xd4e   : > { %v2820_v2 = vpop.eup %2819  ;;  %v2026_v39 = vadd.f32 1.0, %v2818_v36  ;;  %v2029_v44 = vmul.f32 %v2025_v1, %v2013_v16 }
 0xd4f   : > { %v2028_v41 = vadd.f32 1.0, %v2820_v2  ;;  %v2031_v46 = vmul.f32 %v2027_v37, %v2015_v42 }
 0xd50   : > { %v2030_v43 = vmul.f32 %v2026_v39, %v2014_v38 }
 0xd51   : > { %v2032_v45 = vmul.f32 %v2028_v41, %v2016_v40 }
 0xd52   : > { %2168 = vmatprep.mubr.f32.mxu1 %v2030_v43 }
 0xd53   : > { %2238 = vmatprep.mubr.f32.mxu0 %v2032_v45  ;;  %2169 = vmatmul.mubr.f32.vlgmr.msra.gmra.mxu1 %v2029_v44 }
 0xd54   : > { %2239 = vmatmul.mubr.f32.vlgmr.msra.gmra.mxu0 %v2031_v46 }
 0xe13   : > { %v2518_v47 = vpop.f32.mrf.mxu1 }
 0xe14   : > { %v2553_v48 = vpop.f32.mrf.mxu0 }
 0xe15   : > { %v2519_v50 = vpop.f32.mrf.mxu1 }
 0xe16   : > { %v2520_v51 = vadd.f32 %v2519_v50, %v2518_v47  ;;  %v2554_v52 = vpop.f32.mrf.mxu0 }
 0xe17   : > { %v2555_v55 = vadd.f32 %v2554_v52, %v2553_v48 }
 0xe18   : > { %v2171_v54 = vadd.f32 %v2520_v51, %v2428_v49 }
 0xe1a   : > { %v2241_v56 = vadd.f32 %v2555_v55, %v2171_v54 }
 0xe1c   : > { %v2244_v57 = vadd.f32 %v2241_v56, %v3513_v53 }
 0xe1e   : > { %2245 = vst [vmem:[%s538_s9] sm:$0xff] %v2244_v57 }
 0xe1f   : > { %3018 = shalt.err (!%p3015_p4)
}
 0xe20   : > { %s3019_s17 = scalar_lea.hbm %s2258_s20, 128  ;;  %s3023_s30 = scalar_lea.hbm %s3592_s13, 256 }
 0xe21   : > { %p3020_p6 = scmp.ne.s32.totalorder %s2258_s20, %s3019_s17  ;;  %p3024_p7 = scmp.lt.s32.totalorder %s2258_s20, %s3592_s13 }
 0xe22   : > { %p3025_p11 = scmp.lt.s32.totalorder %s3023_s30, %s3019_s17 }
 0xe23   : > { %p3021_p1 = pnand %p3020_p6, %p3629_p13 }
 0xe24   : > { %p3026_p10 = por %p3025_p11, %p3024_p7 }
 0xe25   : > { %p3022_p3 = pneg %p3021_p1 }
 0xe27   : > { %p3027_p12 = pnand %p3026_p10, %p3022_p3 }
 0xe29   : > { %3030 = shalt.err (!%p3027_p12)
}
 0xe2a   : > { %2701 = dma.vmem_to_hbm [thread:$0]  (%p3629_p13), %s2261_s15, 128, %s2258_s20, %s2247_s23  }
 0xe2b PF: > { %s2272_s5 = sand.u32 1, %s3069_s25   ;;  %p3630_p0 = scmp.ne.s32.totalorder %s3619_s22, 0 }
 0xe2c   : > { %p3631_p2 = scmp.ge.s32.totalorder %s3081_s28, 2  ;;  %s2273_s9 = scalar_lea.sflag [#allocation4], %s2272_s5 }
 0xe2e   : > { %p2727_p5 = pnand %p3631_p2, %p3630_p0 }
 0xe30   : > { %p2728_p8 = pneg %p2727_p5 }
 0xe32   : > { %3064 = dma.done.wait (%p2728_p8), %s2273_s9, 128  }
 0xe33   : > { %3066 = vsyncadd (%p2728_p8), %s2273_s9, 4294967168  ;;  %s3632_s3 = sld [smem:[#allocation20_spill]]  ;;  %p29_p9 = scmp.ge.s32.totalorder %s3275_s18, 4  }
 0xe34   : > { %s3633_s27 = sld [smem:[#allocation21_spill]]  ;;  %s3634_s25 = smov %s3073_s26 }
 0xe35   : > { %s3636_s28 = smov %s3275_s18  ;;  %31 = sbr.rel (!%p29_p9) target bundleno = 15 (0xf), region = 144 }
 0xe39   : > { %s3635_s26 = smov %s3632_s3 }
 0xe3a   :  { %2278 = vsyncpa [#allocation3], 1 }
 0xe3b   :  { %2280 = vsyncpa [#allocation3 + $0x1], 1 }
 0xe3c   :  { %2281 = vsyncpa [#allocation6], 1 }
 0xe3d   :  { %2282 = vsyncpa [#allocation9], 1 }
 0xe3e   :  { %2283 = vsyncpa [#allocation12], 1 }
 0xe3f   :  { %2284 = vsyncpa [#allocation4], 1 }
 0xe40   :  { %2286 = vsyncpa [#allocation4 + $0x1], 1 }

</bundles_post_ra>
